<compile_context>
chip_gen: v5e
topology: v5e:2x2
jax: 0.10.0
libtpu: 0.0.40
codegen_flags: <defaults>
</compile_context>

<pallas_src>
import functools

import jax
import jax.numpy as jnp
from jax.experimental import pallas as pl
from jax.experimental.pallas import tpu as pltpu


def _silu(x):
    # silu(x) = x * sigmoid(x); sigmoid via tanh keeps the transcendental on the EUP
    # and avoids a VPU divide (mathematically exact identity, f32 math).
    return x * (0.5 * (jnp.tanh(0.5 * x) + 1.0))


def _linear(h, w_ref, b_ref, compute_dtype):
    # h: (bm, in) f32 activation (or already compute_dtype for the first layer);
    # w_ref: (in, out) in compute_dtype; b_ref: (1, out) f32.
    # The astype is a no-op when h is already compute_dtype.
    lhs = h.astype(compute_dtype)
    return jnp.dot(lhs, w_ref[...], preferred_element_type=jnp.float32) + b_ref[...]


def autoencoder_kernel(x_ref,
                       w1, b1, w2, b2, w3, b3, w4, b4,
                       w5, b5, w6, b6, w7, b7, w8, b8,
                       out_ref, *, compute_dtype):
    lin = functools.partial(_linear, compute_dtype=compute_dtype)
    x = x_ref[...]                      # already in compute_dtype (cast once in wrapper)

    # ---- encode ----
    h = lin(x, w1, b1)
    h = h + _silu(lin(h, w2, b2))
    h = h + _silu(lin(h, w3, b3))
    z = lin(h, w4, b4)

    # ---- decode ----
    h = lin(z, w5, b5)
    h = h + _silu(lin(h, w6, b6))
    h = h + _silu(lin(h, w7, b7))
    x_hat = lin(h, w8, b8)

    # TODO(synk): if the output last dim stays tiny (<128 lanes) and store slots ever
    # saturate, reshape the output to a lane-dense (rows/4, 128) slab instead.
    out_ref[...] = x_hat.astype(out_ref.dtype)


def _round_up(n, m):
    return ((n + m - 1) // m) * m


def _choose_block_batch(batch, desired=512, min_tile=16):
    """Batch tile: big enough to fill the MXU M dim, multiple of 16 (bf16 sublane
    packing), and small enough that the grid keeps >= 2 steps when the batch allows
    (so both v7x TensorCores get work)."""
    if batch <= min_tile:
        return min_tile
    two_way = _round_up((batch + 1) // 2, min_tile)
    return max(min_tile, min(desired, two_way))


def autoencoder_mlp_forward(x, params, *, block_batch=None,
                            compute_dtype=jnp.bfloat16):
    """Full AutoEncoderMLP forward pass in one Pallas kernel.

    Args:
      x: (B, dim) input.
      params: dict with 'w1'..'w8' of shape (in, out) and 'b1'..'b8' of shape (1, out).
      block_batch: batch tile size (auto-chosen if None).
      compute_dtype: dtype fed to the MXU (bf16 by default; accumulation stays f32).
    Returns:
      (B, dim) reconstruction in x.dtype.
    """
    B, dim = x.shape
    hidden_dim = params["w1"].shape[1]
    latent_dim = params["w4"].shape[1]
    out_dtype = x.dtype

    if block_batch is None:
        block_batch = _choose_block_batch(B)
    B_pad = _round_up(B, block_batch)
    if B_pad != B:
        x = jnp.pad(x, ((0, B_pad - B), (0, 0)))

    # Matmul operands in compute_dtype (bf16 halves streamed x/weight DMA bytes and is
    # the native MXU dtype); biases stay f32 so the accumulate/residual path is f32.
    x_in = x.astype(compute_dtype)

    def full_spec(arr):
        # Whole array resident in VMEM, same block for every grid step.
        return pl.BlockSpec(arr.shape, lambda i: (0, 0))

    operands = []
    in_specs = [pl.BlockSpec((block_batch, dim), lambda i: (i, 0))]
    for k in range(1, 9):
        w = params[f"w{k}"].astype(compute_dtype)
        b = params[f"b{k}"].astype(jnp.float32)
        operands += [w, b]
        in_specs += [full_spec(w), full_spec(b)]
    # TODO(synk): if hidden_dim is scaled up (>~2048) the fully-resident double-buffered
    # weights can exceed v7x's 64 MiB VMEM; add a K/N tiling grid axis or
    # pipeline_mode=pl.Buffered(1) on these constant weight specs at that point.

    out_spec = pl.BlockSpec((block_batch, dim), lambda i: (i, 0))

    # Advisory cost estimate so XLA schedules ops around the custom call correctly.
    macs_per_row = (2 * dim * hidden_dim
                    + 4 * hidden_dim * hidden_dim
                    + 2 * hidden_dim * latent_dim)
    weight_bytes = sum(int(a.size) * a.dtype.itemsize for a in operands)
    cost = pl.CostEstimate(
        flops=2 * B_pad * macs_per_row,
        transcendentals=4 * B_pad * hidden_dim,
        bytes_accessed=(B_pad * dim * (x_in.dtype.itemsize
                                       + jnp.dtype(out_dtype).itemsize)
                        + weight_bytes),
    )

    fn = pl.pallas_call(
        functools.partial(autoencoder_kernel, compute_dtype=compute_dtype),
        out_shape=jax.ShapeDtypeStruct((B_pad, dim), out_dtype),
        grid_spec=pltpu.PrefetchScalarGridSpec(
            num_scalar_prefetch=0,
            grid=(B_pad // block_batch,),
            in_specs=in_specs,
            out_specs=out_spec,
        ),
        compiler_params=pltpu.CompilerParams(
            dimension_semantics=("parallel",),
        ),
        cost_estimate=cost,
    )
    out = fn(x_in, *operands)
    return out[:B] if B_pad != B else out


def init_params(key, dim, hidden_dim, latent_dim, dtype=jnp.float32):
    """Deterministic init mimicking torch.nn.Linear's U(-1/sqrt(fan_in), 1/sqrt(fan_in)).

    Weights are stored as (in_features, out_features), i.e. pre-transposed relative to
    PyTorch's (out, in) convention, so the kernel does `x @ W + b`.
    """
    shapes = [
        (dim, hidden_dim),          # linear1
        (hidden_dim, hidden_dim),   # linear2
        (hidden_dim, hidden_dim),   # linear3
        (hidden_dim, latent_dim),   # linear4
        (latent_dim, hidden_dim),   # linear5
        (hidden_dim, hidden_dim),   # linear6
        (hidden_dim, hidden_dim),   # linear7
        (hidden_dim, dim),          # linear8
    ]
    params = {}
    keys = jax.random.split(key, 2 * len(shapes))
    for idx, (fan_in, fan_out) in enumerate(shapes):
        bound = 1.0 / jnp.sqrt(jnp.asarray(fan_in, jnp.float32))
        wk, bk = keys[2 * idx], keys[2 * idx + 1]
        params[f"w{idx + 1}"] = jax.random.uniform(
            wk, (fan_in, fan_out), dtype=dtype, minval=-bound, maxval=bound)
        params[f"b{idx + 1}"] = jax.random.uniform(
            bk, (1, fan_out), dtype=dtype, minval=-bound, maxval=bound)
    # Note: linear_quad exists in __init__ but is unused in forward(); omitted.
    return params


def reference_forward(x, params, compute_dtype=jnp.float32):
    """Pure-JAX reference with the PyTorch forward semantics.

    With compute_dtype=bf16 it mirrors the kernel's numerics (bf16 MXU operands,
    f32 accumulation / biases / residuals) so tolerances can stay tight.
    """
    def lin(h, k):
        w = params[f"w{k}"].astype(compute_dtype)
        b = params[f"b{k}"].astype(jnp.float32)
        return jnp.dot(h.astype(compute_dtype), w,
                       preferred_element_type=jnp.float32) + b

    silu = jax.nn.silu
    h = lin(x, 1)
    h = h + silu(lin(h, 2))
    h = h + silu(lin(h, 3))
    z = lin(h, 4)
    h = lin(z, 5)
    h = h + silu(lin(h, 6))
    h = h + silu(lin(h, 7))
    return lin(h, 8)


if __name__ == "__main__":
    dim, hidden_dim, latent_dim = 32, 64, 16
    batch = 256   # -> 2 grid steps of 128 rows each (both v7x TensorCores get work)

    key = jax.random.PRNGKey(0)
    pkey, xkey = jax.random.split(key)
    params = init_params(pkey, dim, hidden_dim, latent_dim)
    x = jax.random.normal(xkey, (batch, dim), dtype=jnp.float32)

    out = autoencoder_mlp_forward(x, params)          # bf16 MXU operands, f32 accum
    out = jax.block_until_ready(out)
    assert out.shape == (batch, dim)

    # Matched-numerics reference (bf16 operands) -> tight check of the kernel math.
    ref_matched = reference_forward(x, params, compute_dtype=jnp.bfloat16)
    assert jnp.allclose(out, ref_matched, atol=2e-2, rtol=2e-2), \
        "kernel mismatch vs matched-precision JAX reference"

    # End-to-end sanity check against the full-precision reference.
    ref_f32 = reference_forward(x, params, compute_dtype=jnp.float32)
    assert jnp.allclose(out, ref_f32, atol=8e-2, rtol=8e-2), \
        "kernel drifted too far from the f32 reference"

    print("KERNEL_OK")
</pallas_src>

<mosaic_0001>
module attributes {stable_mosaic.version = 11 : i64} {
  func.func @autoencoder_kernel(%arg0: i32, %arg1: memref<128x32xbf16, #tpu.memory_space<vmem>>, %arg2: memref<32x64xbf16, #tpu.memory_space<vmem>>, %arg3: memref<1x64xf32, #tpu.memory_space<vmem>>, %arg4: memref<64x64xbf16, #tpu.memory_space<vmem>>, %arg5: memref<1x64xf32, #tpu.memory_space<vmem>>, %arg6: memref<64x64xbf16, #tpu.memory_space<vmem>>, %arg7: memref<1x64xf32, #tpu.memory_space<vmem>>, %arg8: memref<64x16xbf16, #tpu.memory_space<vmem>>, %arg9: memref<1x16xf32, #tpu.memory_space<vmem>>, %arg10: memref<16x64xbf16, #tpu.memory_space<vmem>>, %arg11: memref<1x64xf32, #tpu.memory_space<vmem>>, %arg12: memref<64x64xbf16, #tpu.memory_space<vmem>>, %arg13: memref<1x64xf32, #tpu.memory_space<vmem>>, %arg14: memref<64x64xbf16, #tpu.memory_space<vmem>>, %arg15: memref<1x64xf32, #tpu.memory_space<vmem>>, %arg16: memref<64x32xbf16, #tpu.memory_space<vmem>>, %arg17: memref<1x32xf32, #tpu.memory_space<vmem>>, %arg18: memref<128x32xf32, #tpu.memory_space<vmem>>) attributes {dimension_semantics = [#tpu.dimension_semantics<parallel>], iteration_bounds = array<i64: 2>, scalar_prefetch = 0 : i64, scratch_operands = 0 : i64, tpu.core_type = #tpu.core_type<tc>, window_params = [{transform_indices = @transform_0, window_bounds = array<i64: 128, 32>}, {pipeline_mode = #tpu.pipeline_mode<synchronous>, transform_indices = @transform_1, window_bounds = array<i64: 32, 64>}, {pipeline_mode = #tpu.pipeline_mode<synchronous>, transform_indices = @transform_2, window_bounds = array<i64: 1, 64>}, {pipeline_mode = #tpu.pipeline_mode<synchronous>, transform_indices = @transform_3, window_bounds = array<i64: 64, 64>}, {pipeline_mode = #tpu.pipeline_mode<synchronous>, transform_indices = @transform_4, window_bounds = array<i64: 1, 64>}, {pipeline_mode = #tpu.pipeline_mode<synchronous>, transform_indices = @transform_5, window_bounds = array<i64: 64, 64>}, {pipeline_mode = #tpu.pipeline_mode<synchronous>, transform_indices = @transform_6, window_bounds = array<i64: 1, 64>}, {pipeline_mode = #tpu.pipeline_mode<synchronous>, transform_indices = @transform_7, window_bounds = array<i64: 64, 16>}, {pipeline_mode = #tpu.pipeline_mode<synchronous>, transform_indices = @transform_8, window_bounds = array<i64: 1, 16>}, {pipeline_mode = #tpu.pipeline_mode<synchronous>, transform_indices = @transform_9, window_bounds = array<i64: 16, 64>}, {pipeline_mode = #tpu.pipeline_mode<synchronous>, transform_indices = @transform_10, window_bounds = array<i64: 1, 64>}, {pipeline_mode = #tpu.pipeline_mode<synchronous>, transform_indices = @transform_11, window_bounds = array<i64: 64, 64>}, {pipeline_mode = #tpu.pipeline_mode<synchronous>, transform_indices = @transform_12, window_bounds = array<i64: 1, 64>}, {pipeline_mode = #tpu.pipeline_mode<synchronous>, transform_indices = @transform_13, window_bounds = array<i64: 64, 64>}, {pipeline_mode = #tpu.pipeline_mode<synchronous>, transform_indices = @transform_14, window_bounds = array<i64: 1, 64>}, {pipeline_mode = #tpu.pipeline_mode<synchronous>, transform_indices = @transform_15, window_bounds = array<i64: 64, 32>}, {pipeline_mode = #tpu.pipeline_mode<synchronous>, transform_indices = @transform_16, window_bounds = array<i64: 1, 32>}, {transform_indices = @transform_17, window_bounds = array<i64: 128, 32>}]} {
    %c0 = arith.constant 0 : index
    %c0_0 = arith.constant 0 : index
    %0 = vector.load %arg1[%c0, %c0_0] : memref<128x32xbf16, #tpu.memory_space<vmem>>, vector<128x32xbf16>
    %c0_1 = arith.constant 0 : index
    %c0_2 = arith.constant 0 : index
    %1 = vector.load %arg2[%c0_1, %c0_2] : memref<32x64xbf16, #tpu.memory_space<vmem>>, vector<32x64xbf16>
    %cst = arith.constant dense<0.000000e+00> : vector<128x64xf32>
    %2 = tpu.matmul %0, %1, %cst {dimension_numbers = #tpu.dot_dimension_numbers<[1], [0], [0], [1], [0, 0, 1, 1], [], []>} : vector<128x32xbf16>, vector<32x64xbf16>, vector<128x64xf32> -> vector<128x64xf32>
    %c0_3 = arith.constant 0 : index
    %c0_4 = arith.constant 0 : index
    %3 = vector.load %arg3[%c0_3, %c0_4] : memref<1x64xf32, #tpu.memory_space<vmem>>, vector<1x64xf32>
    %4 = vector.broadcast %3 : vector<1x64xf32> to vector<128x64xf32>
    %5 = arith.addf %2, %4 : vector<128x64xf32>
    %6 = arith.truncf %5 : vector<128x64xf32> to vector<128x64xbf16>
    %c0_5 = arith.constant 0 : index
    %c0_6 = arith.constant 0 : index
    %7 = vector.load %arg4[%c0_5, %c0_6] : memref<64x64xbf16, #tpu.memory_space<vmem>>, vector<64x64xbf16>
    %cst_7 = arith.constant dense<0.000000e+00> : vector<128x64xf32>
    %8 = tpu.matmul %6, %7, %cst_7 {dimension_numbers = #tpu.dot_dimension_numbers<[1], [0], [0], [1], [0, 0, 1, 1], [], []>} : vector<128x64xbf16>, vector<64x64xbf16>, vector<128x64xf32> -> vector<128x64xf32>
    %c0_8 = arith.constant 0 : index
    %c0_9 = arith.constant 0 : index
    %9 = vector.load %arg5[%c0_8, %c0_9] : memref<1x64xf32, #tpu.memory_space<vmem>>, vector<1x64xf32>
    %10 = vector.broadcast %9 : vector<1x64xf32> to vector<128x64xf32>
    %11 = arith.addf %8, %10 : vector<128x64xf32>
    %cst_10 = arith.constant 5.000000e-01 : f32
    %12 = vector.broadcast %cst_10 : f32 to vector<128x64xf32>
    %13 = arith.mulf %12, %11 : vector<128x64xf32>
    %14 = math.tanh %13 : vector<128x64xf32>
    %cst_11 = arith.constant 1.000000e+00 : f32
    %15 = vector.broadcast %cst_11 : f32 to vector<128x64xf32>
    %16 = arith.addf %14, %15 : vector<128x64xf32>
    %cst_12 = arith.constant 5.000000e-01 : f32
    %17 = vector.broadcast %cst_12 : f32 to vector<128x64xf32>
    %18 = arith.mulf %17, %16 : vector<128x64xf32>
    %19 = arith.mulf %11, %18 : vector<128x64xf32>
    %20 = arith.addf %5, %19 : vector<128x64xf32>
    %21 = arith.truncf %20 : vector<128x64xf32> to vector<128x64xbf16>
    %c0_13 = arith.constant 0 : index
    %c0_14 = arith.constant 0 : index
    %22 = vector.load %arg6[%c0_13, %c0_14] : memref<64x64xbf16, #tpu.memory_space<vmem>>, vector<64x64xbf16>
    %cst_15 = arith.constant dense<0.000000e+00> : vector<128x64xf32>
    %23 = tpu.matmul %21, %22, %cst_15 {dimension_numbers = #tpu.dot_dimension_numbers<[1], [0], [0], [1], [0, 0, 1, 1], [], []>} : vector<128x64xbf16>, vector<64x64xbf16>, vector<128x64xf32> -> vector<128x64xf32>
    %c0_16 = arith.constant 0 : index
    %c0_17 = arith.constant 0 : index
    %24 = vector.load %arg7[%c0_16, %c0_17] : memref<1x64xf32, #tpu.memory_space<vmem>>, vector<1x64xf32>
    %25 = vector.broadcast %24 : vector<1x64xf32> to vector<128x64xf32>
    %26 = arith.addf %23, %25 : vector<128x64xf32>
    %cst_18 = arith.constant 5.000000e-01 : f32
    %27 = vector.broadcast %cst_18 : f32 to vector<128x64xf32>
    %28 = arith.mulf %27, %26 : vector<128x64xf32>
    %29 = math.tanh %28 : vector<128x64xf32>
    %cst_19 = arith.constant 1.000000e+00 : f32
    %30 = vector.broadcast %cst_19 : f32 to vector<128x64xf32>
    %31 = arith.addf %29, %30 : vector<128x64xf32>
    %cst_20 = arith.constant 5.000000e-01 : f32
    %32 = vector.broadcast %cst_20 : f32 to vector<128x64xf32>
    %33 = arith.mulf %32, %31 : vector<128x64xf32>
    %34 = arith.mulf %26, %33 : vector<128x64xf32>
    %35 = arith.addf %20, %34 : vector<128x64xf32>
    %36 = arith.truncf %35 : vector<128x64xf32> to vector<128x64xbf16>
    %c0_21 = arith.constant 0 : index
    %c0_22 = arith.constant 0 : index
    %37 = vector.load %arg8[%c0_21, %c0_22] : memref<64x16xbf16, #tpu.memory_space<vmem>>, vector<64x16xbf16>
    %cst_23 = arith.constant dense<0.000000e+00> : vector<128x16xf32>
    %38 = tpu.matmul %36, %37, %cst_23 {dimension_numbers = #tpu.dot_dimension_numbers<[1], [0], [0], [1], [0, 0, 1, 1], [], []>} : vector<128x64xbf16>, vector<64x16xbf16>, vector<128x16xf32> -> vector<128x16xf32>
    %c0_24 = arith.constant 0 : index
    %c0_25 = arith.constant 0 : index
    %39 = vector.load %arg9[%c0_24, %c0_25] : memref<1x16xf32, #tpu.memory_space<vmem>>, vector<1x16xf32>
    %40 = vector.broadcast %39 : vector<1x16xf32> to vector<128x16xf32>
    %41 = arith.addf %38, %40 : vector<128x16xf32>
    %42 = arith.truncf %41 : vector<128x16xf32> to vector<128x16xbf16>
    %c0_26 = arith.constant 0 : index
    %c0_27 = arith.constant 0 : index
    %43 = vector.load %arg10[%c0_26, %c0_27] : memref<16x64xbf16, #tpu.memory_space<vmem>>, vector<16x64xbf16>
    %cst_28 = arith.constant dense<0.000000e+00> : vector<128x64xf32>
    %44 = tpu.matmul %42, %43, %cst_28 {dimension_numbers = #tpu.dot_dimension_numbers<[1], [0], [0], [1], [0, 0, 1, 1], [], []>} : vector<128x16xbf16>, vector<16x64xbf16>, vector<128x64xf32> -> vector<128x64xf32>
    %c0_29 = arith.constant 0 : index
    %c0_30 = arith.constant 0 : index
    %45 = vector.load %arg11[%c0_29, %c0_30] : memref<1x64xf32, #tpu.memory_space<vmem>>, vector<1x64xf32>
    %46 = vector.broadcast %45 : vector<1x64xf32> to vector<128x64xf32>
    %47 = arith.addf %44, %46 : vector<128x64xf32>
    %48 = arith.truncf %47 : vector<128x64xf32> to vector<128x64xbf16>
    %c0_31 = arith.constant 0 : index
    %c0_32 = arith.constant 0 : index
    %49 = vector.load %arg12[%c0_31, %c0_32] : memref<64x64xbf16, #tpu.memory_space<vmem>>, vector<64x64xbf16>
    %cst_33 = arith.constant dense<0.000000e+00> : vector<128x64xf32>
    %50 = tpu.matmul %48, %49, %cst_33 {dimension_numbers = #tpu.dot_dimension_numbers<[1], [0], [0], [1], [0, 0, 1, 1], [], []>} : vector<128x64xbf16>, vector<64x64xbf16>, vector<128x64xf32> -> vector<128x64xf32>
    %c0_34 = arith.constant 0 : index
    %c0_35 = arith.constant 0 : index
    %51 = vector.load %arg13[%c0_34, %c0_35] : memref<1x64xf32, #tpu.memory_space<vmem>>, vector<1x64xf32>
    %52 = vector.broadcast %51 : vector<1x64xf32> to vector<128x64xf32>
    %53 = arith.addf %50, %52 : vector<128x64xf32>
    %cst_36 = arith.constant 5.000000e-01 : f32
    %54 = vector.broadcast %cst_36 : f32 to vector<128x64xf32>
    %55 = arith.mulf %54, %53 : vector<128x64xf32>
    %56 = math.tanh %55 : vector<128x64xf32>
    %cst_37 = arith.constant 1.000000e+00 : f32
    %57 = vector.broadcast %cst_37 : f32 to vector<128x64xf32>
    %58 = arith.addf %56, %57 : vector<128x64xf32>
    %cst_38 = arith.constant 5.000000e-01 : f32
    %59 = vector.broadcast %cst_38 : f32 to vector<128x64xf32>
    %60 = arith.mulf %59, %58 : vector<128x64xf32>
    %61 = arith.mulf %53, %60 : vector<128x64xf32>
    %62 = arith.addf %47, %61 : vector<128x64xf32>
    %63 = arith.truncf %62 : vector<128x64xf32> to vector<128x64xbf16>
    %c0_39 = arith.constant 0 : index
    %c0_40 = arith.constant 0 : index
    %64 = vector.load %arg14[%c0_39, %c0_40] : memref<64x64xbf16, #tpu.memory_space<vmem>>, vector<64x64xbf16>
    %cst_41 = arith.constant dense<0.000000e+00> : vector<128x64xf32>
    %65 = tpu.matmul %63, %64, %cst_41 {dimension_numbers = #tpu.dot_dimension_numbers<[1], [0], [0], [1], [0, 0, 1, 1], [], []>} : vector<128x64xbf16>, vector<64x64xbf16>, vector<128x64xf32> -> vector<128x64xf32>
    %c0_42 = arith.constant 0 : index
    %c0_43 = arith.constant 0 : index
    %66 = vector.load %arg15[%c0_42, %c0_43] : memref<1x64xf32, #tpu.memory_space<vmem>>, vector<1x64xf32>
    %67 = vector.broadcast %66 : vector<1x64xf32> to vector<128x64xf32>
    %68 = arith.addf %65, %67 : vector<128x64xf32>
    %cst_44 = arith.constant 5.000000e-01 : f32
    %69 = vector.broadcast %cst_44 : f32 to vector<128x64xf32>
    %70 = arith.mulf %69, %68 : vector<128x64xf32>
    %71 = math.tanh %70 : vector<128x64xf32>
    %cst_45 = arith.constant 1.000000e+00 : f32
    %72 = vector.broadcast %cst_45 : f32 to vector<128x64xf32>
    %73 = arith.addf %71, %72 : vector<128x64xf32>
    %cst_46 = arith.constant 5.000000e-01 : f32
    %74 = vector.broadcast %cst_46 : f32 to vector<128x64xf32>
    %75 = arith.mulf %74, %73 : vector<128x64xf32>
    %76 = arith.mulf %68, %75 : vector<128x64xf32>
    %77 = arith.addf %62, %76 : vector<128x64xf32>
    %78 = arith.truncf %77 : vector<128x64xf32> to vector<128x64xbf16>
    %c0_47 = arith.constant 0 : index
    %c0_48 = arith.constant 0 : index
    %79 = vector.load %arg16[%c0_47, %c0_48] : memref<64x32xbf16, #tpu.memory_space<vmem>>, vector<64x32xbf16>
    %cst_49 = arith.constant dense<0.000000e+00> : vector<128x32xf32>
    %80 = tpu.matmul %78, %79, %cst_49 {dimension_numbers = #tpu.dot_dimension_numbers<[1], [0], [0], [1], [0, 0, 1, 1], [], []>} : vector<128x64xbf16>, vector<64x32xbf16>, vector<128x32xf32> -> vector<128x32xf32>
    %c0_50 = arith.constant 0 : index
    %c0_51 = arith.constant 0 : index
    %81 = vector.load %arg17[%c0_50, %c0_51] : memref<1x32xf32, #tpu.memory_space<vmem>>, vector<1x32xf32>
    %82 = vector.broadcast %81 : vector<1x32xf32> to vector<128x32xf32>
    %83 = arith.addf %80, %82 : vector<128x32xf32>
    %c0_52 = arith.constant 0 : index
    %c0_53 = arith.constant 0 : index
    %84 = vector.load %arg18[%c0_52, %c0_53] : memref<128x32xf32, #tpu.memory_space<vmem>>, vector<128x32xf32>
    tpu.vector_store %arg18[%c0_52, %c0_53], %83 {strides = array<i32>} : memref<128x32xf32, #tpu.memory_space<vmem>>, vector<128x32xf32>,
    return
  }
  func.func @transform_0(%arg0: i32) -> (i32, i32) {
    %c0_i32 = arith.constant 0 : i32
    %c0_i32_0 = arith.constant 0 : i32
    return %arg0, %c0_i32 : i32, i32
  }
  func.func @transform_1(%arg0: i32) -> (i32, i32) {
    %c0_i32 = arith.constant 0 : i32
    %c0_i32_0 = arith.constant 0 : i32
    %c0_i32_1 = arith.constant 0 : i32
    return %c0_i32, %c0_i32_0 : i32, i32
  }
  func.func @transform_2(%arg0: i32) -> (i32, i32) {
    %c0_i32 = arith.constant 0 : i32
    %c0_i32_0 = arith.constant 0 : i32
    %c0_i32_1 = arith.constant 0 : i32
    return %c0_i32, %c0_i32_0 : i32, i32
  }
  func.func @transform_3(%arg0: i32) -> (i32, i32) {
    %c0_i32 = arith.constant 0 : i32
    %c0_i32_0 = arith.constant 0 : i32
    %c0_i32_1 = arith.constant 0 : i32
    return %c0_i32, %c0_i32_0 : i32, i32
  }
  func.func @transform_4(%arg0: i32) -> (i32, i32) {
    %c0_i32 = arith.constant 0 : i32
    %c0_i32_0 = arith.constant 0 : i32
    %c0_i32_1 = arith.constant 0 : i32
    return %c0_i32, %c0_i32_0 : i32, i32
  }
  func.func @transform_5(%arg0: i32) -> (i32, i32) {
    %c0_i32 = arith.constant 0 : i32
    %c0_i32_0 = arith.constant 0 : i32
    %c0_i32_1 = arith.constant 0 : i32
    return %c0_i32, %c0_i32_0 : i32, i32
  }
  func.func @transform_6(%arg0: i32) -> (i32, i32) {
    %c0_i32 = arith.constant 0 : i32
    %c0_i32_0 = arith.constant 0 : i32
    %c0_i32_1 = arith.constant 0 : i32
    return %c0_i32, %c0_i32_0 : i32, i32
  }
  func.func @transform_7(%arg0: i32) -> (i32, i32) {
    %c0_i32 = arith.constant 0 : i32
    %c0_i32_0 = arith.constant 0 : i32
    %c0_i32_1 = arith.constant 0 : i32
    return %c0_i32, %c0_i32_0 : i32, i32
  }
  func.func @transform_8(%arg0: i32) -> (i32, i32) {
    %c0_i32 = arith.constant 0 : i32
    %c0_i32_0 = arith.constant 0 : i32
    %c0_i32_1 = arith.constant 0 : i32
    return %c0_i32, %c0_i32_0 : i32, i32
  }
  func.func @transform_9(%arg0: i32) -> (i32, i32) {
    %c0_i32 = arith.constant 0 : i32
    %c0_i32_0 = arith.constant 0 : i32
    %c0_i32_1 = arith.constant 0 : i32
    return %c0_i32, %c0_i32_0 : i32, i32
  }
  func.func @transform_10(%arg0: i32) -> (i32, i32) {
    %c0_i32 = arith.constant 0 : i32
    %c0_i32_0 = arith.constant 0 : i32
    %c0_i32_1 = arith.constant 0 : i32
    return %c0_i32, %c0_i32_0 : i32, i32
  }
  func.func @transform_11(%arg0: i32) -> (i32, i32) {
    %c0_i32 = arith.constant 0 : i32
    %c0_i32_0 = arith.constant 0 : i32
    %c0_i32_1 = arith.constant 0 : i32
    return %c0_i32, %c0_i32_0 : i32, i32
  }
  func.func @transform_12(%arg0: i32) -> (i32, i32) {
    %c0_i32 = arith.constant 0 : i32
    %c0_i32_0 = arith.constant 0 : i32
    %c0_i32_1 = arith.constant 0 : i32
    return %c0_i32, %c0_i32_0 : i32, i32
  }
  func.func @transform_13(%arg0: i32) -> (i32, i32) {
    %c0_i32 = arith.constant 0 : i32
    %c0_i32_0 = arith.constant 0 : i32
    %c0_i32_1 = arith.constant 0 : i32
    return %c0_i32, %c0_i32_0 : i32, i32
  }
  func.func @transform_14(%arg0: i32) -> (i32, i32) {
    %c0_i32 = arith.constant 0 : i32
    %c0_i32_0 = arith.constant 0 : i32
    %c0_i32_1 = arith.constant 0 : i32
    return %c0_i32, %c0_i32_0 : i32, i32
  }
  func.func @transform_15(%arg0: i32) -> (i32, i32) {
    %c0_i32 = arith.constant 0 : i32
    %c0_i32_0 = arith.constant 0 : i32
    %c0_i32_1 = arith.constant 0 : i32
    return %c0_i32, %c0_i32_0 : i32, i32
  }
  func.func @transform_16(%arg0: i32) -> (i32, i32) {
    %c0_i32 = arith.constant 0 : i32
    %c0_i32_0 = arith.constant 0 : i32
    %c0_i32_1 = arith.constant 0 : i32
    return %c0_i32, %c0_i32_0 : i32, i32
  }
  func.func @transform_17(%arg0: i32) -> (i32, i32) {
    %c0_i32 = arith.constant 0 : i32
    %c0_i32_0 = arith.constant 0 : i32
    return %arg0, %c0_i32 : i32, i32
  }
}

</mosaic_0001>

<bundles_post_ra>
// kernel: tpu_custom_call.1
= control target key start
LH: loop header
LB: loop body
LE: loop exit
PB: predicated region body
PF: predicated region fallthrough
CT: control target
= control target key end

     0   :  { %s2448_s24 = smov 0   ;;  %s3000_s0 = inlined_call_operand.vmem [shape: bf16[256,32], index: 0, kind: input, shape index: {}]   ;;  %s3001_s1 = inlined_call_operand.vmem [shape: bf16[32,64], index: 1, kind: input, shape index: {}]   ;;  %s3002_s2 = inlined_call_operand.vmem [shape: f32[1,64], index: 2, kind: input, shape index: {}]   ;;  %s3003_s3 = inlined_call_operand.vmem [shape: bf16[64,64], index: 3, kind: input, shape index: {}]   ;;  %s3004_s4 = inlined_call_operand.vmem [shape: f32[1,64], index: 4, kind: input, shape index: {}]   ;;  %s3005_s5 = inlined_call_operand.vmem [shape: bf16[64,64], index: 5, kind: input, shape index: {}]   ;;  %s3006_s6 = inlined_call_operand.vmem [shape: f32[1,64], index: 6, kind: input, shape index: {}]   ;;  %s3007_s7 = inlined_call_operand.vmem [shape: bf16[64,16], index: 7, kind: input, shape index: {}]   ;;  %s3008_s8 = inlined_call_operand.vmem [shape: f32[1,16], index: 8, kind: input, shape index: {}]   ;;  %s3009_s9 = inlined_call_operand.vmem [shape: bf16[16,64], index: 9, kind: input, shape index: {}]   ;;  %s3010_s10 = inlined_call_operand.vmem [shape: f32[1,64], index: 10, kind: input, shape index: {}]   ;;  %s3011_s11 = inlined_call_operand.vmem [shape: bf16[64,64], index: 11, kind: input, shape index: {}]   ;;  %s3012_s12 = inlined_call_operand.vmem [shape: f32[1,64], index: 12, kind: input, shape index: {}]   ;;  %s3013_s13 = inlined_call_operand.vmem [shape: bf16[64,64], index: 13, kind: input, shape index: {}]   ;;  %s3014_s14 = inlined_call_operand.vmem [shape: f32[1,64], index: 14, kind: input, shape index: {}]   ;;  %s3015_s15 = inlined_call_operand.vmem [shape: bf16[64,32], index: 15, kind: input, shape index: {}]   ;;  %s3016_s16 = inlined_call_operand.vmem [shape: f32[1,32], index: 16, kind: input, shape index: {}]   ;;  %s3017_s17 = inlined_call_operand.vmem [shape: f32[256,32], index: 17, kind: output, shape index: {}]  }
   0x1   :  { %3019 = sst [smem:[#allocation2_spill]] %s3000_s0 }
   0x2   :  { %3020 = sst [smem:[#allocation3_spill]] %s3001_s1 }
   0x3 LB: > { %s1956_s25 = sadd.s32 4294967295, %s2356_s24   ;;  %p1960_p0 = scmp.ge.s32.totalorder %s2356_s24, 1  ;;  %s2356_s24 = sphi %s2448_s24, %s27_s24  }
   0x4   : > { %p488_p1 = scmp.lt.s32.totalorder %s2356_s24, 3 }
   0x6   : > { %p489_p2 = pnand %p1960_p0, %p488_p1 }
   0x7   : > { %s3021_s28 = sld [smem:[#allocation3_spill]] (!%p489_p2)  ;;  %s1961_s29 = sshll.u32 (!%p489_p2), %s1956_s25, 4 }
   0x8   : > { %492 = sbr.rel (%p489_p2) target bundleno = 1328 (0x530), region = 88  ;;  %p541_p3 = scmp.lt.s32.totalorder (!%p489_p2), %s1961_s29, 31 }
   0x9   : > { %s3022_s20 = sld [smem:[#allocation2_spill]] (!%p489_p2) }
   0xd   : > { %v2180_v0 = vld [vmem:[%s3021_s28 + $0x8] sm:$0xff]  ;;  %v2179_v1 = vld [vmem:[%s3021_s28] sm:$0xff]  ;;  %s3024_s29 = smov (!%p541_p3, %s1961_s29), 31  ;;  %vm629_vm0 = vcmask 261120   ;;  %v2184_v8 = vld [vmem:[%s3003_s3 + $0x18] sm:$0xff]  ;;  %vm747_vm1 = vcmask 523264  }
   0xe   : > { %660 = vmatpush.bf16.msra.mxu0 %v2180_v0  ;;  %s1962_s18 = sshll.u32 %s3024_s29, 2  ;;  %776 = vmatpush.bf16.msra.mxu1 %v2184_v8  ;;  %v2183_v10 = vld [vmem:[%s3003_s3 + $0x10] sm:$0xff]  ;;  %v2182_v11 = vld [vmem:[%s3003_s3 + $0x8] sm:$0xff]  ;;  %v2181_v12 = vld [vmem:[%s3003_s3] sm:$0xff]  ;;  %vm1267_vm2 = vcmask 130048   ;;  %s1964_s27 = sshll.u32 %s3024_s29, 3 }
   0xf   : > { %s544_s21 = scalar_lea.vmem %s3022_s20, %s1962_s18  ;;  %v2214_v15 = vld [vmem:[%s3002_s2] ss:$0 sm:$0xff]  ;;  %v2188_v51 = vld [vmem:[%s3005_s5 + $0x18] sm:$0xff]  ;;  %v2187_v56 = vld [vmem:[%s3005_s5 + $0x10] sm:$0xff]  ;;  %s2963_s1 = scalar_lea.vmem %s3017_s17, %s1964_s27 }
  0x10   : > { %v2171_v2 = vld [vmem:[%s544_s21] sm:$0xff]  ;;  %v2172_v3 = vld [vmem:[%s544_s21 + $0x8] sm:$0xff]  ;;  %v2173_v4 = vld [vmem:[%s544_s21 + $0x10] sm:$0xff]  ;;  %989 = vmatpush.bf16.msra.mxu2 %v2188_v51 }
  0x11   : > { %v2174_v5 = vld [vmem:[%s544_s21 + $0x18] sm:$0xff]  ;;  %v2175_v6 = vld [vmem:[%s544_s21 + $0x20] sm:$0xff]  ;;  %v2176_v7 = vld [vmem:[%s544_s21 + $0x28] sm:$0xff] }
  0x12   : > { %661 = vmatpush.bf16.msra.mxu0 %v2179_v1  ;;  %v2177_v9 = vld [vmem:[%s544_s21 + $0x30] sm:$0xff]  ;;  %777 = vmatpush.bf16.msra.mxu1 %v2183_v10  ;;  %v2178_v13 = vld [vmem:[%s544_s21 + $0x38] sm:$0xff]  ;;  %v2186_v57 = vld [vmem:[%s3005_s5 + $0x8] sm:$0xff] }
  0x13   : > { %v2185_v58 = vld [vmem:[%s3005_s5] sm:$0xff] }
  0x14   : > { %990 = vmatpush.bf16.msra.mxu2 %v2187_v56  ;;  %v2562_v59 = vld [vmem:[%s3004_s4] ss:$0 sm:$0xff] }
  0x15   : > { %2005 = vmatmul.msk.bf16.vlgmr.msra.gmra.mxu0 %vm629_vm0, %v2171_v2 }
  0x16   : > { %778 = vmatpush.bf16.msra.mxu1 %v2182_v11 }
  0x18   : > { %991 = vmatpush.bf16.msra.mxu2 %v2186_v57 }
  0x1a   : > { %779 = vmatpush.bf16.msra.mxu1 %v2181_v12 }
  0x1c   : > { %992 = vmatpush.bf16.msra.mxu2 %v2185_v58 }
  0x25   : > { %2006 = vmatmul.msk.bf16.gmra.mxu0 %vm629_vm0, %v2172_v3 }
  0x35   : > { %2007 = vmatmul.msk.bf16.gmra.mxu0 %vm629_vm0, %v2173_v4 }
  0x45   : > { %2008 = vmatmul.msk.bf16.gmra.mxu0 %vm629_vm0, %v2174_v5 }
  0x55   : > { %2009 = vmatmul.msk.bf16.gmra.mxu0 %vm629_vm0, %v2175_v6 }
  0x65   : > { %2010 = vmatmul.msk.bf16.gmra.mxu0 %vm629_vm0, %v2176_v7 }
  0x75   : > { %2011 = vmatmul.msk.bf16.gmra.mxu0 %vm629_vm0, %v2177_v9 }
  0x85   : > { %2012 = vmatmul.msk.bf16.gmra.mxu0 %vm629_vm0, %v2178_v13 }
  0x92   : > { %v663_v14 = vpop.f32.mrf.mxu0 }
  0x93   : > { %v2491_v17 = vadd.f32 %v2214_v15, %v663_v14 }
  0x9a   : > { %v665_v16 = vpop.f32.mrf.mxu0 }
  0x9b   : > { %v2493_v18 = vadd.f32 %v2214_v15, %v665_v16 }
  0x9d   : > { %v703_v19 = vpack.c.bf16 %v2493_v18, %v2491_v17 }
  0x9f   : > { %2029 = vmatmul.msk.bf16.vlgmr.msra.gmra.mxu1 %vm747_vm1, %v703_v19 }
  0xa2   : > { %v668_v20 = vpop.f32.mrf.mxu0 }
  0xa3   : > { %v2498_v22 = vadd.f32 %v2214_v15, %v668_v20 }
  0xaa   : > { %v670_v21 = vpop.f32.mrf.mxu0 }
  0xab   : > { %v2500_v23 = vadd.f32 %v2214_v15, %v670_v21 }
  0xad   : > { %v704_v24 = vpack.c.bf16 %v2500_v23, %v2498_v22 }
  0xaf   : > { %2030 = vmatmul.msk.bf16.gmra.mxu1 %vm747_vm1, %v704_v24 }
  0xb2   : > { %v673_v25 = vpop.f32.mrf.mxu0 }
  0xb3   : > { %v2505_v27 = vadd.f32 %v2214_v15, %v673_v25 }
  0xba   : > { %v675_v26 = vpop.f32.mrf.mxu0 }
  0xbb   : > { %v2507_v28 = vadd.f32 %v2214_v15, %v675_v26 }
  0xbd   : > { %v705_v29 = vpack.c.bf16 %v2507_v28, %v2505_v27 }
  0xbf   : > { %2031 = vmatmul.msk.bf16.gmra.mxu1 %vm747_vm1, %v705_v29 }
  0xc2   : > { %v678_v30 = vpop.f32.mrf.mxu0 }
  0xc3   : > { %v2512_v32 = vadd.f32 %v2214_v15, %v678_v30 }
  0xca   : > { %v680_v31 = vpop.f32.mrf.mxu0 }
  0xcb   : > { %v2514_v33 = vadd.f32 %v2214_v15, %v680_v31 }
  0xcd   : > { %v706_v34 = vpack.c.bf16 %v2514_v33, %v2512_v32 }
  0xcf   : > { %2032 = vmatmul.msk.bf16.gmra.mxu1 %vm747_vm1, %v706_v34 }
  0xd2   : > { %v683_v35 = vpop.f32.mrf.mxu0 }
  0xd3   : > { %v2519_v37 = vadd.f32 %v2214_v15, %v683_v35 }
  0xda   : > { %v685_v36 = vpop.f32.mrf.mxu0 }
  0xdb   : > { %v2521_v38 = vadd.f32 %v2214_v15, %v685_v36 }
  0xdd   : > { %v707_v39 = vpack.c.bf16 %v2521_v38, %v2519_v37 }
  0xdf   : > { %2033 = vmatmul.msk.bf16.gmra.mxu1 %vm747_vm1, %v707_v39 }
  0xe2   : > { %v688_v40 = vpop.f32.mrf.mxu0 }
  0xe3   : > { %v2526_v42 = vadd.f32 %v2214_v15, %v688_v40 }
  0xea   : > { %v690_v41 = vpop.f32.mrf.mxu0 }
  0xeb   : > { %v2528_v43 = vadd.f32 %v2214_v15, %v690_v41 }
  0xed   : > { %v708_v44 = vpack.c.bf16 %v2528_v43, %v2526_v42 }
  0xef   : > { %2034 = vmatmul.msk.bf16.gmra.mxu1 %vm747_vm1, %v708_v44 }
  0xf2   : > { %v693_v45 = vpop.f32.mrf.mxu0 }
  0xf3   : > { %v2533_v47 = vadd.f32 %v2214_v15, %v693_v45 }
  0xfa   : > { %v695_v46 = vpop.f32.mrf.mxu0 }
  0xfb   : > { %v2535_v48 = vadd.f32 %v2214_v15, %v695_v46 }
  0xfd   : > { %v709_v49 = vpack.c.bf16 %v2535_v48, %v2533_v47 }
  0xff   : > { %2035 = vmatmul.msk.bf16.gmra.mxu1 %vm747_vm1, %v709_v49 }
 0x102   : > { %v698_v50 = vpop.f32.mrf.mxu0 }
 0x103   : > { %v2543_v53 = vadd.f32 %v2214_v15, %v698_v50 }
 0x10a   : > { %v700_v52 = vpop.f32.mrf.mxu0 }
 0x10b   : > { %v2545_v54 = vadd.f32 %v2214_v15, %v700_v52 }
 0x10d   : > { %v710_v55 = vpack.c.bf16 %v2545_v54, %v2543_v53 }
 0x10f   : > { %2036 = vmatmul.msk.bf16.gmra.mxu1 %vm747_vm1, %v710_v55 }
 0x11c   : > { %v781_v60 = vpop.f32.mrf.mxu1 }
 0x11d   : > { %v782_v61 = vadd.f32 %v2562_v59, %v781_v60 }
 0x11f   : > { %v821_v62 = vmul.f32 0.5, %v782_v61 }
 0x121   : > { %2222 = vtanh.f32 %v821_v62 }
 0x124   : > { %v783_v63 = vpop.f32.mrf.mxu1 }
 0x125   : > { %v784_v0 = vadd.f32 %v2562_v59, %v783_v63 }
 0x127   : > { %v2223_v1 = vpop.eup %2222  ;;  %v822_v2 = vmul.f32 0.5, %v784_v0 }
 0x128   : > { %v853_v3 = vadd.f32 1.0, %v2223_v1 }
 0x129   : > { %2224 = vtanh.f32 %v822_v2 }
 0x12a   : > { %v869_v6 = vmul.f32 0.5, %v853_v3 }
 0x12c   : > { %v786_v4 = vpop.f32.mrf.mxu1  ;;  %v885_v10 = vmul.f32 %v869_v6, %v782_v61 }
 0x12d   : > { %v787_v5 = vadd.f32 %v2562_v59, %v786_v4 }
 0x12e   : > { %v2569_v15 = vadd.f32 %v885_v10, %v2491_v17 }
 0x12f   : > { %v2225_v7 = vpop.eup %2224  ;;  %v823_v8 = vmul.f32 0.5, %v787_v5 }
 0x130   : > { %v854_v9 = vadd.f32 1.0, %v2225_v7 }
 0x131   : > { %2226 = vtanh.f32 %v823_v8 }
 0x132   : > { %v870_v11 = vmul.f32 0.5, %v854_v9 }
 0x134   : > { %v886_v12 = vmul.f32 %v870_v11, %v784_v0  ;;  %v788_v13 = vpop.f32.mrf.mxu1 }
 0x135   : > { %v789_v14 = vadd.f32 %v2562_v59, %v788_v13 }
 0x136   : > { %v2572_v16 = vadd.f32 %v886_v12, %v2493_v18 }
 0x137   : > { %v2227_v19 = vpop.eup %2226  ;;  %v824_v20 = vmul.f32 0.5, %v789_v14 }
 0x138   : > { %v917_v21 = vpack.c.bf16 %v2572_v16, %v2569_v15  ;;  %v855_v24 = vadd.f32 1.0, %v2227_v19 }
 0x139   : > { %2228 = vtanh.f32 %v824_v20 }
 0x13a   : > { %2053 = vmatmul.msk.bf16.vlgmr.msra.gmra.mxu2 %vm747_vm1, %v917_v21  ;;  %v871_v29 = vmul.f32 0.5, %v855_v24 }
 0x13c   : > { %v791_v25 = vpop.f32.mrf.mxu1  ;;  %v887_v34 = vmul.f32 %v871_v29, %v787_v5 }
 0x13d   : > { %v792_v26 = vadd.f32 %v2562_v59, %v791_v25 }
 0x13e   : > { %v2580_v40 = vadd.f32 %v887_v34, %v2498_v22 }
 0x13f   : > { %v2229_v30 = vpop.eup %2228  ;;  %v825_v31 = vmul.f32 0.5, %v792_v26 }
 0x140   : > { %v856_v17 = vadd.f32 1.0, %v2229_v30 }
 0x141   : > { %2230 = vtanh.f32 %v825_v31 }
 0x142   : > { %v872_v18 = vmul.f32 0.5, %v856_v17 }
 0x144   : > { %v888_v35 = vmul.f32 %v872_v18, %v789_v14  ;;  %v793_v36 = vpop.f32.mrf.mxu1 }
 0x145   : > { %v794_v39 = vadd.f32 %v2562_v59, %v793_v36 }
 0x146   : > { %v2583_v41 = vadd.f32 %v888_v35, %v2500_v23 }
 0x147   : > { %v2231_v44 = vpop.eup %2230  ;;  %v826_v45 = vmul.f32 0.5, %v794_v39 }
 0x148   : > { %v918_v46 = vpack.c.bf16 %v2583_v41, %v2580_v40  ;;  %v857_v49 = vadd.f32 1.0, %v2231_v44 }
 0x149   : > { %2232 = vtanh.f32 %v826_v45 }
 0x14a   : > { %2054 = vmatmul.msk.bf16.gmra.mxu2 %vm747_vm1, %v918_v46  ;;  %v873_v52 = vmul.f32 0.5, %v857_v49 }
 0x14c   : > { %v796_v50 = vpop.f32.mrf.mxu1  ;;  %v889_v57 = vmul.f32 %v873_v52, %v792_v26 }
 0x14d   : > { %v797_v51 = vadd.f32 %v2562_v59, %v796_v50 }
 0x14e   : > { %v2591_v62 = vadd.f32 %v889_v57, %v2505_v27 }
 0x14f   : > { %v2233_v55 = vpop.eup %2232  ;;  %v827_v56 = vmul.f32 0.5, %v797_v51 }
 0x150   : > { %v858_v22 = vadd.f32 1.0, %v2233_v55 }
 0x151   : > { %2234 = vtanh.f32 %v827_v56 }
 0x152   : > { %v874_v23 = vmul.f32 0.5, %v858_v22 }
 0x154   : > { %v890_v58 = vmul.f32 %v874_v23, %v794_v39  ;;  %v798_v60 = vpop.f32.mrf.mxu1 }
 0x155   : > { %v799_v61 = vadd.f32 %v2562_v59, %v798_v60 }
 0x156   : > { %v2594_v63 = vadd.f32 %v890_v58, %v2507_v28 }
 0x157   : > { %v2235_v0 = vpop.eup %2234  ;;  %v828_v1 = vmul.f32 0.5, %v799_v61 }
 0x158   : > { %v919_v2 = vpack.c.bf16 %v2594_v63, %v2591_v62  ;;  %v859_v3 = vadd.f32 1.0, %v2235_v0 }
 0x159   : > { %2236 = vtanh.f32 %v828_v1 }
 0x15a   : > { %2055 = vmatmul.msk.bf16.gmra.mxu2 %vm747_vm1, %v919_v2  ;;  %v875_v6 = vmul.f32 0.5, %v859_v3 }
 0x15c   : > { %v801_v4 = vpop.f32.mrf.mxu1  ;;  %v891_v9 = vmul.f32 %v875_v6, %v797_v51 }
 0x15d   : > { %v802_v5 = vadd.f32 %v2562_v59, %v801_v4 }
 0x15e   : > { %v2602_v13 = vadd.f32 %v891_v9, %v2512_v32 }
 0x15f   : > { %v2237_v7 = vpop.eup %2236  ;;  %v829_v8 = vmul.f32 0.5, %v802_v5 }
 0x160   : > { %v860_v27 = vadd.f32 1.0, %v2237_v7 }
 0x161   : > { %2238 = vtanh.f32 %v829_v8 }
 0x162   : > { %v876_v28 = vmul.f32 0.5, %v860_v27 }
 0x164   : > { %v892_v10 = vmul.f32 %v876_v28, %v799_v61  ;;  %v803_v11 = vpop.f32.mrf.mxu1 }
 0x165   : > { %v804_v12 = vadd.f32 %v2562_v59, %v803_v11 }
 0x166   : > { %v2605_v14 = vadd.f32 %v892_v10, %v2514_v33 }
 0x167   : > { %v2239_v19 = vpop.eup %2238  ;;  %v830_v20 = vmul.f32 0.5, %v804_v12 }
 0x168   : > { %v920_v21 = vpack.c.bf16 %v2605_v14, %v2602_v13  ;;  %v861_v24 = vadd.f32 1.0, %v2239_v19 }
 0x169   : > { %2240 = vtanh.f32 %v830_v20 }
 0x16a   : > { %2056 = vmatmul.msk.bf16.gmra.mxu2 %vm747_vm1, %v920_v21  ;;  %v877_v29 = vmul.f32 0.5, %v861_v24 }
 0x16c   : > { %v806_v25 = vpop.f32.mrf.mxu1  ;;  %v893_v17 = vmul.f32 %v877_v29, %v802_v5 }
 0x16d   : > { %v807_v26 = vadd.f32 %v2562_v59, %v806_v25 }
 0x16e   : > { %v2613_v36 = vadd.f32 %v893_v17, %v2519_v37  ;;  %v2192_v17 = vld [vmem:[%s3007_s7 + $0x18] sm:$0xff] }
 0x16f   : > { %v2241_v30 = vpop.eup %2240  ;;  %v831_v31 = vmul.f32 0.5, %v807_v26  ;;  %1202 = vmatpush.bf16.msra.mxu3 %v2192_v17 }
 0x170   : > { %v862_v32 = vadd.f32 1.0, %v2241_v30 }
 0x171   : > { %2242 = vtanh.f32 %v831_v31 }
 0x172   : > { %v878_v33 = vmul.f32 0.5, %v862_v32 }
 0x174   : > { %v894_v34 = vmul.f32 %v878_v33, %v804_v12  ;;  %v808_v18 = vpop.f32.mrf.mxu1  ;;  %v2191_v33 = vld [vmem:[%s3007_s7 + $0x10] sm:$0xff] }
 0x175   : > { %v809_v35 = vadd.f32 %v2562_v59, %v808_v18  ;;  %1203 = vmatpush.bf16.msra.mxu3 %v2191_v33 }
 0x176   : > { %v2616_v39 = vadd.f32 %v894_v34, %v2521_v38  ;;  %v2667_v34 = vld [vmem:[%s3006_s6] ss:$0 sm:$0xff] }
 0x177   : > { %v2243_v44 = vpop.eup %2242  ;;  %v832_v45 = vmul.f32 0.5, %v809_v35 }
 0x178   : > { %v921_v46 = vpack.c.bf16 %v2616_v39, %v2613_v36  ;;  %v863_v49 = vadd.f32 1.0, %v2243_v44 }
 0x179   : > { %2244 = vtanh.f32 %v832_v45 }
 0x17a   : > { %2057 = vmatmul.msk.bf16.gmra.mxu2 %vm747_vm1, %v921_v46  ;;  %v879_v52 = vmul.f32 0.5, %v863_v49 }
 0x17c   : > { %v811_v50 = vpop.f32.mrf.mxu1  ;;  %v895_v22 = vmul.f32 %v879_v52, %v807_v26 }
 0x17d   : > { %v812_v51 = vadd.f32 %v2562_v59, %v811_v50 }
 0x17e   : > { %v2624_v60 = vadd.f32 %v895_v22, %v2526_v42 }
 0x17f   : > { %v2245_v55 = vpop.eup %2244  ;;  %v833_v56 = vmul.f32 0.5, %v812_v51 }
 0x180   : > { %v864_v37 = vadd.f32 1.0, %v2245_v55 }
 0x181   : > { %2246 = vtanh.f32 %v833_v56 }
 0x182   : > { %v880_v38 = vmul.f32 0.5, %v864_v37 }
 0x184   : > { %v896_v57 = vmul.f32 %v880_v38, %v809_v35  ;;  %v813_v23 = vpop.f32.mrf.mxu1 }
 0x185   : > { %v814_v58 = vadd.f32 %v2562_v59, %v813_v23 }
 0x186   : > { %v2627_v61 = vadd.f32 %v896_v57, %v2528_v43 }
 0x187   : > { %v2247_v0 = vpop.eup %2246  ;;  %v834_v1 = vmul.f32 0.5, %v814_v58 }
 0x188   : > { %v922_v2 = vpack.c.bf16 %v2627_v61, %v2624_v60  ;;  %v865_v3 = vadd.f32 1.0, %v2247_v0 }
 0x189   : > { %2248 = vtanh.f32 %v834_v1 }
 0x18a   : > { %2058 = vmatmul.msk.bf16.gmra.mxu2 %vm747_vm1, %v922_v2  ;;  %v881_v6 = vmul.f32 0.5, %v865_v3 }
 0x18c   : > { %v816_v4 = vpop.f32.mrf.mxu1  ;;  %v897_v27 = vmul.f32 %v881_v6, %v812_v51 }
 0x18d   : > { %v817_v5 = vadd.f32 %v2562_v59, %v816_v4  ;;  %v2193_v4 = vld [vmem:[%s3009_s9] sm:$0xff] }
 0x18e   : > { %v2635_v11 = vadd.f32 %v897_v27, %v2533_v47  ;;  %1299 = vmatpush.bf16.msrb.mxu0 %v2193_v4 }
 0x18f   : > { %v2249_v7 = vpop.eup %2248  ;;  %v835_v8 = vmul.f32 0.5, %v817_v5 }
 0x190   : > { %v866_v42 = vadd.f32 1.0, %v2249_v7 }
 0x191   : > { %2250 = vtanh.f32 %v835_v8 }
 0x192   : > { %v882_v43 = vmul.f32 0.5, %v866_v42 }
 0x194   : > { %v898_v9 = vmul.f32 %v882_v43, %v814_v58  ;;  %v818_v28 = vpop.f32.mrf.mxu1 }
 0x195   : > { %v819_v10 = vadd.f32 %v2562_v59, %v818_v28 }
 0x196   : > { %v2638_v12 = vadd.f32 %v898_v9, %v2535_v48 }
 0x197   : > { %v2251_v19 = vpop.eup %2250  ;;  %v836_v20 = vmul.f32 0.5, %v819_v10 }
 0x198   : > { %v923_v21 = vpack.c.bf16 %v2638_v12, %v2635_v11  ;;  %v867_v24 = vadd.f32 1.0, %v2251_v19 }
 0x199   : > { %2252 = vtanh.f32 %v836_v20 }
 0x19a   : > { %2059 = vmatmul.msk.bf16.gmra.mxu2 %vm747_vm1, %v923_v21  ;;  %v883_v25 = vmul.f32 0.5, %v867_v24 }
 0x19c   : > { %v899_v30 = vmul.f32 %v883_v25, %v817_v5 }
 0x19e   : > { %v2644_v47 = vadd.f32 %v899_v30, %v2543_v53  ;;  %v2190_v53 = vld [vmem:[%s3007_s7 + $0x8] sm:$0xff] }
 0x19f   : > { %v2253_v26 = vpop.eup %2252  ;;  %1204 = vmatpush.bf16.msra.mxu3 %v2190_v53 }
 0x1a0   : > { %v868_v29 = vadd.f32 1.0, %v2253_v26 }
 0x1a2   : > { %v884_v59 = vmul.f32 0.5, %v868_v29 }
 0x1a4   : > { %v900_v31 = vmul.f32 %v884_v59, %v819_v10 }
 0x1a6   : > { %v2647_v48 = vadd.f32 %v900_v31, %v2545_v54  ;;  %v2189_v54 = vld [vmem:[%s3007_s7] sm:$0xff] }
 0x1a7   : > { %1205 = vmatpush.bf16.msra.mxu3 %v2189_v54 }
 0x1a8   : > { %v924_v32 = vpack.c.bf16 %v2647_v48, %v2644_v47 }
 0x1aa   : > { %2060 = vmatmul.msk.bf16.gmra.mxu2 %vm747_vm1, %v924_v32 }
 0x1bd   : > { %v994_v18 = vpop.f32.mrf.mxu2 }
 0x1be   : > { %v995_v35 = vadd.f32 %v2667_v34, %v994_v18 }
 0x1c0   : > { %v1034_v44 = vmul.f32 0.5, %v995_v35 }
 0x1c2   : > { %2254 = vtanh.f32 %v1034_v44 }
 0x1c5   : > { %v996_v45 = vpop.f32.mrf.mxu2 }
 0x1c6   : > { %v997_v46 = vadd.f32 %v2667_v34, %v996_v45 }
 0x1c8   : > { %v2255_v49 = vpop.eup %2254  ;;  %v1035_v50 = vmul.f32 0.5, %v997_v46 }
 0x1c9   : > { %v1066_v51 = vadd.f32 1.0, %v2255_v49 }
 0x1ca   : > { %2256 = vtanh.f32 %v1035_v50 }
 0x1cb   : > { %v1082_v56 = vmul.f32 0.5, %v1066_v51 }
 0x1cd   : > { %v999_v52 = vpop.f32.mrf.mxu2  ;;  %v1098_v57 = vmul.f32 %v1082_v56, %v995_v35 }
 0x1ce   : > { %v1000_v55 = vadd.f32 %v2667_v34, %v999_v52 }
 0x1cf   : > { %v1114_v2 = vadd.f32 %v1098_v57, %v2569_v15 }
 0x1d0   : > { %v2257_v37 = vpop.eup %2256  ;;  %v1036_v22 = vmul.f32 0.5, %v1000_v55 }
 0x1d1   : > { %v1067_v38 = vadd.f32 1.0, %v2257_v37 }
 0x1d2   : > { %2258 = vtanh.f32 %v1036_v22 }
 0x1d3   : > { %v1083_v23 = vmul.f32 0.5, %v1067_v38 }
 0x1d5   : > { %v1099_v58 = vmul.f32 %v1083_v23, %v997_v46  ;;  %v1001_v0 = vpop.f32.mrf.mxu2 }
 0x1d6   : > { %v1002_v1 = vadd.f32 %v2667_v34, %v1001_v0 }
 0x1d7   : > { %v1115_v3 = vadd.f32 %v1099_v58, %v2572_v16 }
 0x1d8   : > { %v2259_v5 = vpop.eup %2258  ;;  %v1037_v6 = vmul.f32 0.5, %v1002_v1 }
 0x1d9   : > { %v1130_v7 = vpack.c.bf16 %v1115_v3, %v1114_v2  ;;  %v1068_v8 = vadd.f32 1.0, %v2259_v5 }
 0x1da   : > { %2260 = vtanh.f32 %v1037_v6 }
 0x1db   : > { %2077 = vmatmul.msk.bf16.vlgmr.msra.gmra.mxu3 %vm747_vm1, %v1130_v7  ;;  %v1084_v43 = vmul.f32 0.5, %v1068_v8 }
 0x1dd   : > { %v1004_v42 = vpop.f32.mrf.mxu2  ;;  %v1100_v16 = vmul.f32 %v1084_v43, %v1000_v55 }
 0x1de   : > { %v1005_v27 = vadd.f32 %v2667_v34, %v1004_v42 }
 0x1df   : > { %v1116_v24 = vadd.f32 %v1100_v16, %v2580_v40 }
 0x1e0   : > { %v2261_v9 = vpop.eup %2260  ;;  %v1038_v15 = vmul.f32 0.5, %v1005_v27 }
 0x1e1   : > { %v1069_v28 = vadd.f32 1.0, %v2261_v9 }
 0x1e2   : > { %2262 = vtanh.f32 %v1038_v15 }
 0x1e3   : > { %v1085_v10 = vmul.f32 0.5, %v1069_v28 }
 0x1e5   : > { %v1101_v19 = vmul.f32 %v1085_v10, %v1002_v1  ;;  %v1006_v20 = vpop.f32.mrf.mxu2 }
 0x1e6   : > { %v1007_v21 = vadd.f32 %v2667_v34, %v1006_v20 }
 0x1e7   : > { %v1117_v25 = vadd.f32 %v1101_v19, %v2583_v41 }
 0x1e8   : > { %v2263_v26 = vpop.eup %2262  ;;  %v1039_v29 = vmul.f32 0.5, %v1007_v21 }
 0x1e9   : > { %v1131_v30 = vpack.c.bf16 %v1117_v25, %v1116_v24  ;;  %v1070_v59 = vadd.f32 1.0, %v2263_v26 }
 0x1ea   : > { %2264 = vtanh.f32 %v1039_v29 }
 0x1eb   : > { %2078 = vmatmul.msk.bf16.gmra.mxu3 %vm747_vm1, %v1131_v30  ;;  %v1086_v17 = vmul.f32 0.5, %v1070_v59 }
 0x1ed   : > { %v1009_v31 = vpop.f32.mrf.mxu2  ;;  %v1102_v18 = vmul.f32 %v1086_v17, %v1005_v27 }
 0x1ee   : > { %v1010_v32 = vadd.f32 %v2667_v34, %v1009_v31 }
 0x1ef   : > { %v1118_v45 = vadd.f32 %v1102_v18, %v2591_v62 }
 0x1f0   : > { %v2265_v33 = vpop.eup %2264  ;;  %v1040_v53 = vmul.f32 0.5, %v1010_v32 }
 0x1f1   : > { %v1071_v54 = vadd.f32 1.0, %v2265_v33 }
 0x1f2   : > { %2266 = vtanh.f32 %v1040_v53 }
 0x1f3   : > { %v1087_v35 = vmul.f32 0.5, %v1071_v54 }
 0x1f5   : > { %v1103_v40 = vmul.f32 %v1087_v35, %v1007_v21  ;;  %v1011_v44 = vpop.f32.mrf.mxu2 }
 0x1f6   : > { %v1012_v41 = vadd.f32 %v2667_v34, %v1011_v44 }
 0x1f7   : > { %v1119_v46 = vadd.f32 %v1103_v40, %v2594_v63 }
 0x1f8   : > { %v2267_v49 = vpop.eup %2266  ;;  %v1041_v50 = vmul.f32 0.5, %v1012_v41 }
 0x1f9   : > { %v1132_v51 = vpack.c.bf16 %v1119_v46, %v1118_v45  ;;  %v1072_v52 = vadd.f32 1.0, %v2267_v49 }
 0x1fa   : > { %2268 = vtanh.f32 %v1041_v50 }
 0x1fb   : > { %2079 = vmatmul.msk.bf16.gmra.mxu3 %vm747_vm1, %v1132_v51  ;;  %v1088_v37 = vmul.f32 0.5, %v1072_v52 }
 0x1fd   : > { %v1014_v55 = vpop.f32.mrf.mxu2  ;;  %v1104_v23 = vmul.f32 %v1088_v37, %v1010_v32 }
 0x1fe   : > { %v1015_v56 = vadd.f32 %v2667_v34, %v1014_v55 }
 0x1ff   : > { %v1120_v1 = vadd.f32 %v1104_v23, %v2602_v13 }
 0x200   : > { %v2269_v22 = vpop.eup %2268  ;;  %v1042_v38 = vmul.f32 0.5, %v1015_v56 }
 0x201   : > { %v1073_v57 = vadd.f32 1.0, %v2269_v22 }
 0x202   : > { %2270 = vtanh.f32 %v1042_v38 }
 0x203   : > { %v1089_v58 = vmul.f32 0.5, %v1073_v57 }
 0x205   : > { %v1105_v62 = vmul.f32 %v1089_v58, %v1012_v41  ;;  %v1016_v0 = vpop.f32.mrf.mxu2 }
 0x206   : > { %v1017_v63 = vadd.f32 %v2667_v34, %v1016_v0 }
 0x207   : > { %v1121_v2 = vadd.f32 %v1105_v62, %v2605_v14 }
 0x208   : > { %v2271_v3 = vpop.eup %2270  ;;  %v1043_v4 = vmul.f32 0.5, %v1017_v63 }
 0x209   : > { %v1133_v5 = vpack.c.bf16 %v1121_v2, %v1120_v1  ;;  %v1074_v6 = vadd.f32 1.0, %v2271_v3 }
 0x20a   : > { %2272 = vtanh.f32 %v1043_v4 }
 0x20b   : > { %2080 = vmatmul.msk.bf16.gmra.mxu3 %vm747_vm1, %v1133_v5  ;;  %v1090_v42 = vmul.f32 0.5, %v1074_v6 }
 0x20d   : > { %v1019_v7 = vpop.f32.mrf.mxu2  ;;  %v1106_v15 = vmul.f32 %v1090_v42, %v1015_v56 }
 0x20e   : > { %v1020_v8 = vadd.f32 %v2667_v34, %v1019_v7  ;;  %v2217_v7 = vld [vmem:[%s3008_s8] ss:$0 sm:$0xff] }
 0x20f   : > { %v1122_v10 = vadd.f32 %v1106_v15, %v2613_v36 }
 0x210   : > { %v2273_v27 = vpop.eup %2272  ;;  %v1044_v43 = vmul.f32 0.5, %v1020_v8 }
 0x211   : > { %v1075_v9 = vadd.f32 1.0, %v2273_v27 }
 0x212   : > { %2274 = vtanh.f32 %v1044_v43  ;;  %v2196_v43 = vld [vmem:[%s3011_s11 + $0x10] sm:$0xff] }
 0x213   : > { %v1091_v28 = vmul.f32 0.5, %v1075_v9 }
 0x215   : > { %v1107_v13 = vmul.f32 %v1091_v28, %v1017_v63  ;;  %v1021_v16 = vpop.f32.mrf.mxu2 }
 0x216   : > { %v1022_v14 = vadd.f32 %v2667_v34, %v1021_v16 }
 0x217   : > { %v1123_v19 = vadd.f32 %v1107_v13, %v2616_v39 }
 0x218   : > { %v2275_v20 = vpop.eup %2274  ;;  %v1045_v21 = vmul.f32 0.5, %v1022_v14 }
 0x219   : > { %v1134_v24 = vpack.c.bf16 %v1123_v19, %v1122_v10  ;;  %v1076_v25 = vadd.f32 1.0, %v2275_v20 }
 0x21a   : > { %2276 = vtanh.f32 %v1045_v21 }
 0x21b   : > { %2081 = vmatmul.msk.bf16.gmra.mxu3 %vm747_vm1, %v1134_v24  ;;  %v1092_v30 = vmul.f32 0.5, %v1076_v25  ;;  %v2195_v24 = vld [vmem:[%s3011_s11 + $0x8] sm:$0xff] }
 0x21d   : > { %v1024_v26 = vpop.f32.mrf.mxu2  ;;  %v1108_v17 = vmul.f32 %v1092_v30, %v1020_v8 }
 0x21e   : > { %v1025_v29 = vadd.f32 %v2667_v34, %v1024_v26 }
 0x21f   : > { %v1124_v54 = vadd.f32 %v1108_v17, %v2624_v60 }
 0x220   : > { %v2277_v59 = vpop.eup %2276  ;;  %v1046_v31 = vmul.f32 0.5, %v1025_v29 }
 0x221   : > { %v1077_v32 = vadd.f32 1.0, %v2277_v59 }
 0x222   : > { %2278 = vtanh.f32 %v1046_v31 }
 0x223   : > { %v1093_v33 = vmul.f32 0.5, %v1077_v32 }
 0x225   : > { %v1109_v36 = vmul.f32 %v1093_v33, %v1022_v14  ;;  %v1026_v53 = vpop.f32.mrf.mxu2 }
 0x226   : > { %v1027_v39 = vadd.f32 %v2667_v34, %v1026_v53  ;;  %v2194_v53 = vld [vmem:[%s3011_s11] sm:$0xff] }
 0x227   : > { %v1125_v18 = vadd.f32 %v1109_v36, %v2627_v61 }
 0x228   : > { %v2279_v35 = vpop.eup %2278  ;;  %v1047_v40 = vmul.f32 0.5, %v1027_v39 }
 0x229   : > { %v1135_v44 = vpack.c.bf16 %v1125_v18, %v1124_v54  ;;  %v1078_v41 = vadd.f32 1.0, %v2279_v35 }
 0x22a   : > { %2280 = vtanh.f32 %v1047_v40 }
 0x22b   : > { %2082 = vmatmul.msk.bf16.gmra.mxu3 %vm747_vm1, %v1135_v44  ;;  %v1094_v49 = vmul.f32 0.5, %v1078_v41 }
 0x22d   : > { %v1029_v45 = vpop.f32.mrf.mxu2  ;;  %v1110_v55 = vmul.f32 %v1094_v49, %v1025_v29 }
 0x22e   : > { %v1030_v46 = vadd.f32 %v2667_v34, %v1029_v45 }
 0x22f   : > { %v1126_v22 = vadd.f32 %v1110_v55, %v2635_v11 }
 0x230   : > { %v2281_v50 = vpop.eup %2280  ;;  %v1048_v51 = vmul.f32 0.5, %v1030_v46 }
 0x231   : > { %v1079_v52 = vadd.f32 1.0, %v2281_v50 }
 0x232   : > { %2282 = vtanh.f32 %v1048_v51 }
 0x233   : > { %v1095_v56 = vmul.f32 0.5, %v1079_v52 }
 0x235   : > { %v1111_v60 = vmul.f32 %v1095_v56, %v1027_v39  ;;  %v1031_v37 = vpop.f32.mrf.mxu2 }
 0x236   : > { %v1032_v61 = vadd.f32 %v2667_v34, %v1031_v37 }
 0x237   : > { %v1127_v38 = vadd.f32 %v1111_v60, %v2638_v12  ;;  %v2197_v12 = vld [vmem:[%s3011_s11 + $0x18] sm:$0xff]  ;;  %v2218_v60 = vld [vmem:[%s3010_s10] ss:$0 sm:$0xff] }
 0x238   : > { %v2283_v57 = vpop.eup %2282  ;;  %v1049_v23 = vmul.f32 0.5, %v1032_v61  ;;  %1413 = vmatpush.bf16.msrb.mxu1 %v2197_v12 }
 0x239   : > { %v1136_v58 = vpack.c.bf16 %v1127_v38, %v1126_v22  ;;  %v1080_v62 = vadd.f32 1.0, %v2283_v57  ;;  %v2201_v57 = vld [vmem:[%s3013_s13 + $0x18] sm:$0xff] }
 0x23a   : > { %2284 = vtanh.f32 %v1049_v23  ;;  %1626 = vmatpush.bf16.msrb.mxu2 %v2201_v57 }
 0x23b   : > { %2083 = vmatmul.msk.bf16.gmra.mxu3 %vm747_vm1, %v1136_v58  ;;  %v1096_v0 = vmul.f32 0.5, %v1080_v62 }
 0x23c   : > { %1414 = vmatpush.bf16.msrb.mxu1 %v2196_v43 }
 0x23d   : > { %v1112_v2 = vmul.f32 %v1096_v0, %v1030_v46 }
 0x23f   : > { %v1128_v5 = vadd.f32 %v1112_v2, %v2644_v47 }
 0x240   : > { %v2285_v63 = vpop.eup %2284  ;;  %1415 = vmatpush.bf16.msrb.mxu1 %v2195_v24 }
 0x241   : > { %v1081_v1 = vadd.f32 1.0, %v2285_v63 }
 0x243   : > { %v1097_v3 = vmul.f32 0.5, %v1081_v1 }
 0x244   : > { %1416 = vmatpush.bf16.msrb.mxu1 %v2194_v53 }
 0x245   : > { %v1113_v4 = vmul.f32 %v1097_v3, %v1032_v61 }
 0x247   : > { %v1129_v34 = vadd.f32 %v1113_v4, %v2647_v48 }
 0x249   : > { %v1137_v11 = vpack.c.bf16 %v1129_v34, %v1128_v5  ;;  %v2200_v34 = vld [vmem:[%s3013_s13 + $0x10] sm:$0xff] }
 0x24a   : > { %1627 = vmatpush.bf16.msrb.mxu2 %v2200_v34 }
 0x24b   : > { %2084 = vmatmul.msk.bf16.gmra.mxu3 %vm747_vm1, %v1137_v11 }
 0x25e   : > { %v1207_v6 = vpop.f32.mrf.mxu3 }
 0x25f   : > { %v1208_v42 = vadd.f32 %v2217_v7, %v1207_v6 }
 0x266   : > { %v1209_v8 = vpop.f32.mrf.mxu3 }
 0x267   : > { %v1210_v27 = vadd.f32 %v2217_v7, %v1209_v8 }
 0x269   : > { %v1247_v47 = vpack.c.bf16 %v1210_v27, %v1208_v42 }
 0x26b   : > { %2089 = vmatmul.msk.bf16.vlgmr.msrb.gmra.mxu0 %vm1267_vm2, %v1247_v47 }
 0x26e   : > { %v1212_v48 = vpop.f32.mrf.mxu3 }
 0x26f   : > { %v1213_v15 = vadd.f32 %v2217_v7, %v1212_v48 }
 0x276   : > { %v1214_v9 = vpop.f32.mrf.mxu3 }
 0x277   : > { %v1215_v28 = vadd.f32 %v2217_v7, %v1214_v9  ;;  %v2199_v9 = vld [vmem:[%s3013_s13 + $0x8] sm:$0xff] }
 0x278   : > { %1628 = vmatpush.bf16.msrb.mxu2 %v2199_v9  ;;  %v2205_v9 = vld [vmem:[%s3015_s15 + $0x18] sm:$0xff] }
 0x279   : > { %v1248_v13 = vpack.c.bf16 %v1215_v28, %v1213_v15  ;;  %1839 = vmatpush.bf16.msrb.mxu3 %v2205_v9 }
 0x27b   : > { %2090 = vmatmul.msk.bf16.gmra.mxu0 %vm1267_vm2, %v1248_v13 }
 0x27e   : > { %v1217_v16 = vpop.f32.mrf.mxu3 }
 0x27f   : > { %v1218_v10 = vadd.f32 %v2217_v7, %v1217_v16 }
 0x286   : > { %v1219_v14 = vpop.f32.mrf.mxu3 }
 0x287   : > { %v1220_v19 = vadd.f32 %v2217_v7, %v1219_v14 }
 0x289   : > { %v1249_v20 = vpack.c.bf16 %v1220_v19, %v1218_v10  ;;  %v2198_v10 = vld [vmem:[%s3013_s13] sm:$0xff] }
 0x28a   : > { %1629 = vmatpush.bf16.msrb.mxu2 %v2198_v10 }
 0x28b   : > { %2091 = vmatmul.msk.bf16.gmra.mxu0 %vm1267_vm2, %v1249_v20 }
 0x28e   : > { %v1222_v21 = vpop.f32.mrf.mxu3 }
 0x28f   : > { %v1223_v26 = vadd.f32 %v2217_v7, %v1222_v21 }
 0x296   : > { %v1224_v25 = vpop.f32.mrf.mxu3 }
 0x297   : > { %v1225_v29 = vadd.f32 %v2217_v7, %v1224_v25 }
 0x299   : > { %v1250_v30 = vpack.c.bf16 %v1225_v29, %v1223_v26 }
 0x29b   : > { %2092 = vmatmul.msk.bf16.gmra.mxu0 %vm1267_vm2, %v1250_v30 }
 0x29e   : > { %v1227_v59 = vpop.f32.mrf.mxu3 }
 0x29f   : > { %v1228_v32 = vadd.f32 %v2217_v7, %v1227_v59 }
 0x2a6   : > { %v1229_v31 = vpop.f32.mrf.mxu3 }
 0x2a7   : > { %v1230_v17 = vadd.f32 %v2217_v7, %v1229_v31 }
 0x2a9   : > { %v1251_v33 = vpack.c.bf16 %v1230_v17, %v1228_v32  ;;  %v2809_v32 = vld [vmem:[%s3012_s12] ss:$0 sm:$0xff] }
 0x2ab   : > { %2093 = vmatmul.msk.bf16.gmra.mxu0 %vm1267_vm2, %v1251_v33 }
 0x2ae   : > { %v1232_v36 = vpop.f32.mrf.mxu3 }
 0x2af   : > { %v1233_v54 = vadd.f32 %v2217_v7, %v1232_v36 }
 0x2b6   : > { %v1234_v39 = vpop.f32.mrf.mxu3 }
 0x2b7   : > { %v1235_v18 = vadd.f32 %v2217_v7, %v1234_v39 }
 0x2b9   : > { %v1252_v35 = vpack.c.bf16 %v1235_v18, %v1233_v54 }
 0x2bb   : > { %2094 = vmatmul.msk.bf16.gmra.mxu0 %vm1267_vm2, %v1252_v35 }
 0x2be   : > { %v1237_v40 = vpop.f32.mrf.mxu3 }
 0x2bf   : > { %v1238_v41 = vadd.f32 %v2217_v7, %v1237_v40 }
 0x2c6   : > { %v1239_v44 = vpop.f32.mrf.mxu3 }
 0x2c7   : > { %v1240_v45 = vadd.f32 %v2217_v7, %v1239_v44 }
 0x2c9   : > { %v1253_v46 = vpack.c.bf16 %v1240_v45, %v1238_v41 }
 0x2cb   : > { %2095 = vmatmul.msk.bf16.gmra.mxu0 %vm1267_vm2, %v1253_v46 }
 0x2ce   : > { %v1242_v49 = vpop.f32.mrf.mxu3 }
 0x2cf   : > { %v1243_v51 = vadd.f32 %v2217_v7, %v1242_v49 }
 0x2d6   : > { %v1244_v50 = vpop.f32.mrf.mxu3 }
 0x2d7   : > { %v1245_v52 = vadd.f32 %v2217_v7, %v1244_v50 }
 0x2d9   : > { %v1254_v55 = vpack.c.bf16 %v1245_v52, %v1243_v51 }
 0x2db   : > { %2096 = vmatmul.msk.bf16.gmra.mxu0 %vm1267_vm2, %v1254_v55 }
 0x2e8   : > { %v1301_v56 = vpop.f32.mrf.mxu0 }
 0x2e9   : > { %v2738_v61 = vadd.f32 %v2218_v60, %v1301_v56 }
 0x2f0   : > { %v1303_v37 = vpop.f32.mrf.mxu0 }
 0x2f1   : > { %v2740_v22 = vadd.f32 %v2218_v60, %v1303_v37 }
 0x2f3   : > { %v1341_v38 = vpack.c.bf16 %v2740_v22, %v2738_v61 }
 0x2f5   : > { %2113 = vmatmul.msk.bf16.vlgmr.msrb.gmra.mxu1 %vm747_vm1, %v1341_v38 }
 0x2f8   : > { %v1306_v23 = vpop.f32.mrf.mxu0 }
 0x2f9   : > { %v2748_v62 = vadd.f32 %v2218_v60, %v1306_v23 }
 0x300   : > { %v1308_v58 = vpop.f32.mrf.mxu0 }
 0x301   : > { %v2750_v0 = vadd.f32 %v2218_v60, %v1308_v58 }
 0x303   : > { %v1342_v63 = vpack.c.bf16 %v2750_v0, %v2748_v62 }
 0x305   : > { %2114 = vmatmul.msk.bf16.gmra.mxu1 %vm747_vm1, %v1342_v63 }
 0x308   : > { %v1311_v1 = vpop.f32.mrf.mxu0 }
 0x309   : > { %v2755_v3 = vadd.f32 %v2218_v60, %v1311_v1 }
 0x310   : > { %v1313_v2 = vpop.f32.mrf.mxu0 }
 0x311   : > { %v2757_v4 = vadd.f32 %v2218_v60, %v1313_v2 }
 0x313   : > { %v1343_v5 = vpack.c.bf16 %v2757_v4, %v2755_v3 }
 0x315   : > { %2115 = vmatmul.msk.bf16.gmra.mxu1 %vm747_vm1, %v1343_v5 }
 0x318   : > { %v1316_v11 = vpop.f32.mrf.mxu0 }
 0x319   : > { %v2765_v6 = vadd.f32 %v2218_v60, %v1316_v11 }
 0x320   : > { %v1318_v12 = vpop.f32.mrf.mxu0 }
 0x321   : > { %v2767_v7 = vadd.f32 %v2218_v60, %v1318_v12 }
 0x323   : > { %v1344_v8 = vpack.c.bf16 %v2767_v7, %v2765_v6 }
 0x325   : > { %2116 = vmatmul.msk.bf16.gmra.mxu1 %vm747_vm1, %v1344_v8 }
 0x328   : > { %v1321_v42 = vpop.f32.mrf.mxu0 }
 0x329   : > { %v2772_v47 = vadd.f32 %v2218_v60, %v1321_v42 }
 0x330   : > { %v1323_v27 = vpop.f32.mrf.mxu0 }
 0x331   : > { %v2774_v48 = vadd.f32 %v2218_v60, %v1323_v27 }
 0x333   : > { %v1345_v43 = vpack.c.bf16 %v2774_v48, %v2772_v47 }
 0x335   : > { %2117 = vmatmul.msk.bf16.gmra.mxu1 %vm747_vm1, %v1345_v43 }
 0x338   : > { %v1326_v15 = vpop.f32.mrf.mxu0 }
 0x339   : > { %v2782_v13 = vadd.f32 %v2218_v60, %v1326_v15 }
 0x340   : > { %v1328_v28 = vpop.f32.mrf.mxu0 }
 0x341   : > { %v2784_v16 = vadd.f32 %v2218_v60, %v1328_v28 }
 0x343   : > { %v1346_v14 = vpack.c.bf16 %v2784_v16, %v2782_v13 }
 0x345   : > { %2118 = vmatmul.msk.bf16.gmra.mxu1 %vm747_vm1, %v1346_v14 }
 0x348   : > { %v1331_v19 = vpop.f32.mrf.mxu0 }
 0x349   : > { %v2792_v21 = vadd.f32 %v2218_v60, %v1331_v19 }
 0x350   : > { %v1333_v20 = vpop.f32.mrf.mxu0 }
 0x351   : > { %v2794_v24 = vadd.f32 %v2218_v60, %v1333_v20 }
 0x353   : > { %v1347_v25 = vpack.c.bf16 %v2794_v24, %v2792_v21 }
 0x355   : > { %2119 = vmatmul.msk.bf16.gmra.mxu1 %vm747_vm1, %v1347_v25 }
 0x358   : > { %v1336_v26 = vpop.f32.mrf.mxu0 }
 0x359   : > { %v2799_v30 = vadd.f32 %v2218_v60, %v1336_v26 }
 0x360   : > { %v1338_v29 = vpop.f32.mrf.mxu0 }
 0x361   : > { %v2801_v59 = vadd.f32 %v2218_v60, %v1338_v29 }
 0x363   : > { %v1348_v31 = vpack.c.bf16 %v2801_v59, %v2799_v30 }
 0x365   : > { %2120 = vmatmul.msk.bf16.gmra.mxu1 %vm747_vm1, %v1348_v31 }
 0x372   : > { %v1418_v17 = vpop.f32.mrf.mxu1 }
 0x373   : > { %v1419_v33 = vadd.f32 %v2809_v32, %v1418_v17 }
 0x375   : > { %v1458_v36 = vmul.f32 0.5, %v1419_v33 }
 0x377   : > { %2286 = vtanh.f32 %v1458_v36 }
 0x37a   : > { %v1420_v53 = vpop.f32.mrf.mxu1 }
 0x37b   : > { %v1421_v39 = vadd.f32 %v2809_v32, %v1420_v53 }
 0x37d   : > { %v2287_v54 = vpop.eup %2286  ;;  %v1459_v18 = vmul.f32 0.5, %v1421_v39 }
 0x37e   : > { %v1490_v35 = vadd.f32 1.0, %v2287_v54 }
 0x37f   : > { %2288 = vtanh.f32 %v1459_v18 }
 0x380   : > { %v1506_v41 = vmul.f32 0.5, %v1490_v35 }
 0x382   : > { %v1423_v40 = vpop.f32.mrf.mxu1  ;;  %v1522_v50 = vmul.f32 %v1506_v41, %v1419_v33 }
 0x383   : > { %v1424_v44 = vadd.f32 %v2809_v32, %v1423_v40 }
 0x384   : > { %v2816_v60 = vadd.f32 %v1522_v50, %v2738_v61 }
 0x385   : > { %v2289_v45 = vpop.eup %2288  ;;  %v1460_v46 = vmul.f32 0.5, %v1424_v44 }
 0x386   : > { %v1491_v49 = vadd.f32 1.0, %v2289_v45 }
 0x387   : > { %2290 = vtanh.f32 %v1460_v46 }
 0x388   : > { %v1507_v51 = vmul.f32 0.5, %v1491_v49 }
 0x38a   : > { %v1523_v52 = vmul.f32 %v1507_v51, %v1421_v39  ;;  %v1425_v55 = vpop.f32.mrf.mxu1 }
 0x38b   : > { %v1426_v56 = vadd.f32 %v2809_v32, %v1425_v55 }
 0x38c   : > { %v2819_v37 = vadd.f32 %v1523_v52, %v2740_v22 }
 0x38d   : > { %v2291_v38 = vpop.eup %2290  ;;  %v1461_v57 = vmul.f32 0.5, %v1426_v56 }
 0x38e   : > { %v1554_v23 = vpack.c.bf16 %v2819_v37, %v2816_v60  ;;  %v1492_v58 = vadd.f32 1.0, %v2291_v38 }
 0x38f   : > { %2292 = vtanh.f32 %v1461_v57 }
 0x390   : > { %2137 = vmatmul.msk.bf16.vlgmr.msrb.gmra.mxu2 %vm747_vm1, %v1554_v23  ;;  %v1508_v2 = vmul.f32 0.5, %v1492_v58 }
 0x392   : > { %v1428_v63 = vpop.f32.mrf.mxu1  ;;  %v1524_v11 = vmul.f32 %v1508_v2, %v1424_v44 }
 0x393   : > { %v1429_v1 = vadd.f32 %v2809_v32, %v1428_v63  ;;  %v2204_v63 = vld [vmem:[%s3015_s15 + $0x10] sm:$0xff] }
 0x394   : > { %v2827_v27 = vadd.f32 %v1524_v11, %v2748_v62  ;;  %1840 = vmatpush.bf16.msrb.mxu3 %v2204_v63 }
 0x395   : > { %v2293_v5 = vpop.eup %2292  ;;  %v1462_v34 = vmul.f32 0.5, %v1429_v1 }
 0x396   : > { %v1493_v61 = vadd.f32 1.0, %v2293_v5 }
 0x397   : > { %2294 = vtanh.f32 %v1462_v34 }
 0x398   : > { %v1509_v22 = vmul.f32 0.5, %v1493_v61 }
 0x39a   : > { %v1525_v12 = vmul.f32 %v1509_v22, %v1426_v56  ;;  %v1430_v8 = vpop.f32.mrf.mxu1 }
 0x39b   : > { %v1431_v42 = vadd.f32 %v2809_v32, %v1430_v8 }
 0x39c   : > { %v2830_v43 = vadd.f32 %v1525_v12, %v2750_v0 }
 0x39d   : > { %v2295_v15 = vpop.eup %2294  ;;  %v1463_v28 = vmul.f32 0.5, %v1431_v42 }
 0x39e   : > { %v1555_v14 = vpack.c.bf16 %v2830_v43, %v2827_v27  ;;  %v1494_v10 = vadd.f32 1.0, %v2295_v15 }
 0x39f   : > { %2296 = vtanh.f32 %v1463_v28 }
 0x3a0   : > { %2138 = vmatmul.msk.bf16.gmra.mxu2 %vm747_vm1, %v1555_v14  ;;  %v1510_v20 = vmul.f32 0.5, %v1494_v10 }
 0x3a2   : > { %v1433_v19 = vpop.f32.mrf.mxu1  ;;  %v1526_v29 = vmul.f32 %v1510_v20, %v1429_v1 }
 0x3a3   : > { %v1434_v62 = vadd.f32 %v2809_v32, %v1433_v19 }
 0x3a4   : > { %v2841_v53 = vadd.f32 %v1526_v29, %v2755_v3 }
 0x3a5   : > { %v2297_v0 = vpop.eup %2296  ;;  %v1464_v25 = vmul.f32 0.5, %v1434_v62 }
 0x3a6   : > { %v1495_v26 = vadd.f32 1.0, %v2297_v0 }
 0x3a7   : > { %2298 = vtanh.f32 %v1464_v25 }
 0x3a8   : > { %v1511_v31 = vmul.f32 0.5, %v1495_v26 }
 0x3aa   : > { %v1527_v17 = vmul.f32 %v1511_v31, %v1431_v42  ;;  %v1435_v33 = vpop.f32.mrf.mxu1 }
 0x3ab   : > { %v1436_v36 = vadd.f32 %v2809_v32, %v1435_v33 }
 0x3ac   : > { %v2844_v39 = vadd.f32 %v1527_v17, %v2757_v4 }
 0x3ad   : > { %v2299_v54 = vpop.eup %2298  ;;  %v1465_v18 = vmul.f32 0.5, %v1436_v36 }
 0x3ae   : > { %v1556_v35 = vpack.c.bf16 %v2844_v39, %v2841_v53  ;;  %v1496_v40 = vadd.f32 1.0, %v2299_v54 }
 0x3af   : > { %2300 = vtanh.f32 %v1465_v18 }
 0x3b0   : > { %2139 = vmatmul.msk.bf16.gmra.mxu2 %vm747_vm1, %v1556_v35  ;;  %v1512_v45 = vmul.f32 0.5, %v1496_v40 }
 0x3b2   : > { %v1438_v44 = vpop.f32.mrf.mxu1  ;;  %v1528_v50 = vmul.f32 %v1512_v45, %v1434_v62 }
 0x3b3   : > { %v1439_v41 = vadd.f32 %v2809_v32, %v1438_v44  ;;  %v2203_v44 = vld [vmem:[%s3015_s15 + $0x8] sm:$0xff] }
 0x3b4   : > { %v2852_v56 = vadd.f32 %v1528_v50, %v2765_v6  ;;  %1841 = vmatpush.bf16.msrb.mxu3 %v2203_v44 }
 0x3b5   : > { %v2301_v46 = vpop.eup %2300  ;;  %v1466_v49 = vmul.f32 0.5, %v1439_v41 }
 0x3b6   : > { %v1497_v3 = vadd.f32 1.0, %v2301_v46 }
 0x3b7   : > { %2302 = vtanh.f32 %v1466_v49 }
 0x3b8   : > { %v1513_v4 = vmul.f32 0.5, %v1497_v3 }
 0x3ba   : > { %v1529_v51 = vmul.f32 %v1513_v4, %v1436_v36  ;;  %v1440_v52 = vpop.f32.mrf.mxu1 }
 0x3bb   : > { %v1441_v55 = vadd.f32 %v2809_v32, %v1440_v52 }
 0x3bc   : > { %v2855_v38 = vadd.f32 %v1529_v51, %v2767_v7 }
 0x3bd   : > { %v2303_v57 = vpop.eup %2302  ;;  %v1467_v23 = vmul.f32 0.5, %v1441_v55 }
 0x3be   : > { %v1557_v58 = vpack.c.bf16 %v2855_v38, %v2852_v56  ;;  %v1498_v1 = vadd.f32 1.0, %v2303_v57 }
 0x3bf   : > { %2304 = vtanh.f32 %v1467_v23 }
 0x3c0   : > { %2140 = vmatmul.msk.bf16.gmra.mxu2 %vm747_vm1, %v1557_v58  ;;  %v1514_v5 = vmul.f32 0.5, %v1498_v1 }
 0x3c2   : > { %v1443_v2 = vpop.f32.mrf.mxu1  ;;  %v1530_v11 = vmul.f32 %v1514_v5, %v1439_v41 }
 0x3c3   : > { %v1444_v6 = vadd.f32 %v2809_v32, %v1443_v2 }
 0x3c4   : > { %v2866_v9 = vadd.f32 %v1530_v11, %v2772_v47 }
 0x3c5   : > { %v2305_v7 = vpop.eup %2304  ;;  %v1468_v34 = vmul.f32 0.5, %v1444_v6 }
 0x3c6   : > { %v1499_v61 = vadd.f32 1.0, %v2305_v7 }
 0x3c7   : > { %2306 = vtanh.f32 %v1468_v34 }
 0x3c8   : > { %v1515_v22 = vmul.f32 0.5, %v1499_v61 }
 0x3ca   : > { %v1531_v12 = vmul.f32 %v1515_v22, %v1441_v55  ;;  %v1445_v8 = vpop.f32.mrf.mxu1 }
 0x3cb   : > { %v1446_v42 = vadd.f32 %v2809_v32, %v1445_v8 }
 0x3cc   : > { %v2869_v15 = vadd.f32 %v1531_v12, %v2774_v48  ;;  %v2914_v12 = vld [vmem:[%s3014_s14] ss:$0 sm:$0xff] }
 0x3cd   : > { %v2307_v28 = vpop.eup %2306  ;;  %v1469_v14 = vmul.f32 0.5, %v1446_v42 }
 0x3ce   : > { %v1558_v10 = vpack.c.bf16 %v2869_v15, %v2866_v9  ;;  %v1500_v19 = vadd.f32 1.0, %v2307_v28 }
 0x3cf   : > { %2308 = vtanh.f32 %v1469_v14 }
 0x3d0   : > { %2141 = vmatmul.msk.bf16.gmra.mxu2 %vm747_vm1, %v1558_v10  ;;  %v1516_v0 = vmul.f32 0.5, %v1500_v19 }
 0x3d2   : > { %v1448_v62 = vpop.f32.mrf.mxu1  ;;  %v1532_v29 = vmul.f32 %v1516_v0, %v1444_v6 }
 0x3d3   : > { %v1449_v20 = vadd.f32 %v2809_v32, %v1448_v62 }
 0x3d4   : > { %v2877_v36 = vadd.f32 %v1532_v29, %v2782_v13  ;;  %v2202_v13 = vld [vmem:[%s3015_s15] sm:$0xff] }
 0x3d5   : > { %v2309_v25 = vpop.eup %2308  ;;  %v1470_v26 = vmul.f32 0.5, %v1449_v20  ;;  %1842 = vmatpush.bf16.msrb.mxu3 %v2202_v13 }
 0x3d6   : > { %v1501_v47 = vadd.f32 1.0, %v2309_v25 }
 0x3d7   : > { %2310 = vtanh.f32 %v1470_v26 }
 0x3d8   : > { %v1517_v48 = vmul.f32 0.5, %v1501_v47 }
 0x3da   : > { %v1533_v31 = vmul.f32 %v1517_v48, %v1446_v42  ;;  %v1450_v17 = vpop.f32.mrf.mxu1 }
 0x3db   : > { %v1451_v33 = vadd.f32 %v2809_v32, %v1450_v17 }
 0x3dc   : > { %v2880_v54 = vadd.f32 %v1533_v31, %v2784_v16 }
 0x3dd   : > { %v2311_v18 = vpop.eup %2310  ;;  %v1471_v35 = vmul.f32 0.5, %v1451_v33 }
 0x3de   : > { %v1559_v40 = vpack.c.bf16 %v2880_v54, %v2877_v36  ;;  %v1502_v41 = vadd.f32 1.0, %v2311_v18 }
 0x3df   : > { %2312 = vtanh.f32 %v1471_v35 }
 0x3e0   : > { %2142 = vmatmul.msk.bf16.gmra.mxu2 %vm747_vm1, %v1559_v40  ;;  %v1518_v46 = vmul.f32 0.5, %v1502_v41 }
 0x3e2   : > { %v1453_v16 = vpop.f32.mrf.mxu1  ;;  %v1534_v4 = vmul.f32 %v1518_v46, %v1449_v20 }
 0x3e3   : > { %v1454_v45 = vadd.f32 %v2809_v32, %v1453_v16 }
 0x3e4   : > { %v2894_v23 = vadd.f32 %v1534_v4, %v2792_v21 }
 0x3e5   : > { %v2313_v49 = vpop.eup %2312  ;;  %v1472_v3 = vmul.f32 0.5, %v1454_v45 }
 0x3e6   : > { %v1503_v50 = vadd.f32 1.0, %v2313_v49 }
 0x3e7   : > { %2314 = vtanh.f32 %v1472_v3 }
 0x3e8   : > { %v1519_v51 = vmul.f32 0.5, %v1503_v50 }
 0x3ea   : > { %v1535_v52 = vmul.f32 %v1519_v51, %v1451_v33  ;;  %v1455_v55 = vpop.f32.mrf.mxu1 }
 0x3eb   : > { %v1456_v57 = vadd.f32 %v2809_v32, %v1455_v55 }
 0x3ec   : > { %v2897_v58 = vadd.f32 %v1535_v52, %v2794_v24 }
 0x3ed   : > { %v2315_v63 = vpop.eup %2314  ;;  %v1473_v1 = vmul.f32 0.5, %v1456_v57 }
 0x3ee   : > { %v1560_v2 = vpack.c.bf16 %v2897_v58, %v2894_v23  ;;  %v1504_v6 = vadd.f32 1.0, %v2315_v63 }
 0x3ef   : > { %2316 = vtanh.f32 %v1473_v1 }
 0x3f0   : > { %2143 = vmatmul.msk.bf16.gmra.mxu2 %vm747_vm1, %v1560_v2  ;;  %v1520_v5 = vmul.f32 0.5, %v1504_v6 }
 0x3f2   : > { %v1536_v61 = vmul.f32 %v1520_v5, %v1454_v45 }
 0x3f4   : > { %v2903_v21 = vadd.f32 %v1536_v61, %v2799_v30 }
 0x3f5   : > { %v2317_v7 = vpop.eup %2316 }
 0x3f6   : > { %v1505_v34 = vadd.f32 1.0, %v2317_v7 }
 0x3f8   : > { %v1521_v32 = vmul.f32 0.5, %v1505_v34 }
 0x3fa   : > { %v1537_v11 = vmul.f32 %v1521_v32, %v1456_v57 }
 0x3fc   : > { %v2906_v24 = vadd.f32 %v1537_v11, %v2801_v59 }
 0x3fe   : > { %v1561_v22 = vpack.c.bf16 %v2906_v24, %v2903_v21 }
 0x400   : > { %2144 = vmatmul.msk.bf16.gmra.mxu2 %vm747_vm1, %v1561_v22 }
 0x413   : > { %v1631_v8 = vpop.f32.mrf.mxu2 }
 0x414   : > { %v1632_v42 = vadd.f32 %v2914_v12, %v1631_v8 }
 0x416   : > { %v1671_v28 = vmul.f32 0.5, %v1632_v42 }
 0x418   : > { %2318 = vtanh.f32 %v1671_v28 }
 0x41b   : > { %v1633_v30 = vpop.f32.mrf.mxu2 }
 0x41c   : > { %v1634_v14 = vadd.f32 %v2914_v12, %v1633_v30 }
 0x41e   : > { %v2319_v59 = vpop.eup %2318  ;;  %v1672_v10 = vmul.f32 0.5, %v1634_v14 }
 0x41f   : > { %v1703_v19 = vadd.f32 1.0, %v2319_v59 }
 0x420   : > { %2320 = vtanh.f32 %v1672_v10 }
 0x421   : > { %v1719_v0 = vmul.f32 0.5, %v1703_v19 }
 0x423   : > { %v1636_v62 = vpop.f32.mrf.mxu2  ;;  %v1735_v29 = vmul.f32 %v1719_v0, %v1632_v42 }
 0x424   : > { %v1637_v20 = vadd.f32 %v2914_v12, %v1636_v62 }
 0x425   : > { %v1751_v18 = vadd.f32 %v1735_v29, %v2816_v60 }
 0x426   : > { %v2321_v25 = vpop.eup %2320  ;;  %v1673_v26 = vmul.f32 0.5, %v1637_v20 }
 0x427   : > { %v1704_v47 = vadd.f32 1.0, %v2321_v25 }
 0x428   : > { %2322 = vtanh.f32 %v1673_v26 }
 0x429   : > { %v1720_v48 = vmul.f32 0.5, %v1704_v47 }
 0x42b   : > { %v1736_v31 = vmul.f32 %v1720_v48, %v1634_v14  ;;  %v1638_v17 = vpop.f32.mrf.mxu2 }
 0x42c   : > { %v1639_v33 = vadd.f32 %v2914_v12, %v1638_v17 }
 0x42d   : > { %v1752_v35 = vadd.f32 %v1736_v31, %v2819_v37 }
 0x42e   : > { %v2323_v40 = vpop.eup %2322  ;;  %v1674_v44 = vmul.f32 0.5, %v1639_v33 }
 0x42f   : > { %v1767_v41 = vpack.c.bf16 %v1752_v35, %v1751_v18  ;;  %v1705_v13 = vadd.f32 1.0, %v2323_v40 }
 0x430   : > { %2324 = vtanh.f32 %v1674_v44 }
 0x431   : > { %2161 = vmatmul.msk.bf16.vlgmr.msrb.gmra.mxu3 %vm747_vm1, %v1767_v41  ;;  %v1721_v46 = vmul.f32 0.5, %v1705_v13 }
 0x433   : > { %v1641_v16 = vpop.f32.mrf.mxu2  ;;  %v1737_v4 = vmul.f32 %v1721_v46, %v1637_v20 }
 0x434   : > { %v1642_v45 = vadd.f32 %v2914_v12, %v1641_v16 }
 0x435   : > { %v1753_v55 = vadd.f32 %v1737_v4, %v2827_v27 }
 0x436   : > { %v2325_v49 = vpop.eup %2324  ;;  %v1675_v3 = vmul.f32 0.5, %v1642_v45 }
 0x437   : > { %v1706_v50 = vadd.f32 1.0, %v2325_v49 }
 0x438   : > { %2326 = vtanh.f32 %v1675_v3 }
 0x439   : > { %v1722_v51 = vmul.f32 0.5, %v1706_v50 }
 0x43b   : > { %v1738_v60 = vmul.f32 %v1722_v51, %v1639_v33  ;;  %v1643_v52 = vpop.f32.mrf.mxu2 }
 0x43c   : > { %v1644_v37 = vadd.f32 %v2914_v12, %v1643_v52 }
 0x43d   : > { %v1754_v57 = vadd.f32 %v1738_v60, %v2830_v43 }
 0x43e   : > { %v2327_v63 = vpop.eup %2326  ;;  %v1676_v1 = vmul.f32 0.5, %v1644_v37 }
 0x43f   : > { %v1768_v2 = vpack.c.bf16 %v1754_v57, %v1753_v55  ;;  %v1707_v6 = vadd.f32 1.0, %v2327_v63 }
 0x440   : > { %2328 = vtanh.f32 %v1676_v1 }
 0x441   : > { %2162 = vmatmul.msk.bf16.gmra.mxu3 %vm747_vm1, %v1768_v2  ;;  %v1723_v34 = vmul.f32 0.5, %v1707_v6 }
 0x443   : > { %v1646_v5 = vpop.f32.mrf.mxu2  ;;  %v1739_v22 = vmul.f32 %v1723_v34, %v1642_v45 }
 0x444   : > { %v1647_v7 = vadd.f32 %v2914_v12, %v1646_v5 }
 0x445   : > { %v1755_v28 = vadd.f32 %v1739_v22, %v2841_v53 }
 0x446   : > { %v2329_v61 = vpop.eup %2328  ;;  %v1677_v32 = vmul.f32 0.5, %v1647_v7 }
 0x447   : > { %v1708_v11 = vadd.f32 1.0, %v2329_v61 }
 0x448   : > { %2330 = vtanh.f32 %v1677_v32 }
 0x449   : > { %v1724_v8 = vmul.f32 0.5, %v1708_v11 }
 0x44b   : > { %v1740_v27 = vmul.f32 %v1724_v8, %v1644_v37  ;;  %v1648_v42 = vpop.f32.mrf.mxu2 }
 0x44c   : > { %v1649_v43 = vadd.f32 %v2914_v12, %v1648_v42 }
 0x44d   : > { %v1756_v30 = vadd.f32 %v1740_v27, %v2844_v39 }
 0x44e   : > { %v2331_v14 = vpop.eup %2330  ;;  %v1678_v59 = vmul.f32 0.5, %v1649_v43 }
 0x44f   : > { %v1769_v10 = vpack.c.bf16 %v1756_v30, %v1755_v28  ;;  %v1709_v19 = vadd.f32 1.0, %v2331_v14 }
 0x450   : > { %2332 = vtanh.f32 %v1678_v59 }
 0x451   : > { %2163 = vmatmul.msk.bf16.gmra.mxu3 %vm747_vm1, %v1769_v10  ;;  %v1725_v0 = vmul.f32 0.5, %v1709_v19 }
 0x453   : > { %v1651_v62 = vpop.f32.mrf.mxu2  ;;  %v1741_v29 = vmul.f32 %v1725_v0, %v1647_v7 }
 0x454   : > { %v1652_v20 = vadd.f32 %v2914_v12, %v1651_v62 }
 0x455   : > { %v1757_v17 = vadd.f32 %v1741_v29, %v2852_v56 }
 0x456   : > { %v2333_v25 = vpop.eup %2332  ;;  %v1679_v26 = vmul.f32 0.5, %v1652_v20 }
 0x457   : > { %v1710_v47 = vadd.f32 1.0, %v2333_v25 }
 0x458   : > { %2334 = vtanh.f32 %v1679_v26 }
 0x459   : > { %v1726_v48 = vmul.f32 0.5, %v1710_v47 }
 0x45b   : > { %v1742_v53 = vmul.f32 %v1726_v48, %v1649_v43  ;;  %v1653_v31 = vpop.f32.mrf.mxu2 }
 0x45c   : > { %v1654_v39 = vadd.f32 %v2914_v12, %v1653_v31 }
 0x45d   : > { %v1758_v33 = vadd.f32 %v1742_v53, %v2855_v38 }
 0x45e   : > { %v2335_v18 = vpop.eup %2334  ;;  %v1680_v35 = vmul.f32 0.5, %v1654_v39 }
 0x45f   : > { %v1770_v40 = vpack.c.bf16 %v1758_v33, %v1757_v17  ;;  %v1711_v44 = vadd.f32 1.0, %v2335_v18 }
 0x460   : > { %2336 = vtanh.f32 %v1680_v35 }
 0x461   : > { %2164 = vmatmul.msk.bf16.gmra.mxu3 %vm747_vm1, %v1770_v40  ;;  %v1727_v16 = vmul.f32 0.5, %v1711_v44 }
 0x463   : > { %v1656_v41 = vpop.f32.mrf.mxu2  ;;  %v1743_v3 = vmul.f32 %v1727_v16, %v1652_v20 }
 0x464   : > { %v1657_v13 = vadd.f32 %v2914_v12, %v1656_v41 }
 0x465   : > { %v1759_v51 = vadd.f32 %v1743_v3, %v2866_v9 }
 0x466   : > { %v2337_v45 = vpop.eup %2336  ;;  %v1681_v46 = vmul.f32 0.5, %v1657_v13 }
 0x467   : > { %v1712_v49 = vadd.f32 1.0, %v2337_v45 }
 0x468   : > { %2338 = vtanh.f32 %v1681_v46 }
 0x469   : > { %v1728_v50 = vmul.f32 0.5, %v1712_v49 }
 0x46b   : > { %v1744_v56 = vmul.f32 %v1728_v50, %v1654_v39  ;;  %v1658_v4 = vpop.f32.mrf.mxu2 }
 0x46c   : > { %v1659_v38 = vadd.f32 %v2914_v12, %v1658_v4 }
 0x46d   : > { %v1760_v60 = vadd.f32 %v1744_v56, %v2869_v15 }
 0x46e   : > { %v2339_v52 = vpop.eup %2338  ;;  %v1682_v37 = vmul.f32 0.5, %v1659_v38 }
 0x46f   : > { %v1771_v55 = vpack.c.bf16 %v1760_v60, %v1759_v51  ;;  %v1713_v57 = vadd.f32 1.0, %v2339_v52 }
 0x470   : > { %2340 = vtanh.f32 %v1682_v37 }
 0x471   : > { %2165 = vmatmul.msk.bf16.gmra.mxu3 %vm747_vm1, %v1771_v55  ;;  %v1729_v2 = vmul.f32 0.5, %v1713_v57 }
 0x473   : > { %v1661_v63 = vpop.f32.mrf.mxu2  ;;  %v1745_v34 = vmul.f32 %v1729_v2, %v1657_v13 }
 0x474   : > { %v1662_v1 = vadd.f32 %v2914_v12, %v1661_v63 }
 0x475   : > { %v1761_v11 = vadd.f32 %v1745_v34, %v2877_v36 }
 0x476   : > { %v2341_v6 = vpop.eup %2340  ;;  %v1683_v5 = vmul.f32 0.5, %v1662_v1 }
 0x477   : > { %v1714_v7 = vadd.f32 1.0, %v2341_v6 }
 0x478   : > { %2342 = vtanh.f32 %v1683_v5 }
 0x479   : > { %v1730_v61 = vmul.f32 0.5, %v1714_v7 }
 0x47b   : > { %v1746_v9 = vmul.f32 %v1730_v61, %v1659_v38  ;;  %v1663_v32 = vpop.f32.mrf.mxu2 }
 0x47c   : > { %v1664_v15 = vadd.f32 %v2914_v12, %v1663_v32 }
 0x47d   : > { %v1762_v22 = vadd.f32 %v1746_v9, %v2880_v54 }
 0x47e   : > { %v2343_v8 = vpop.eup %2342  ;;  %v1684_v27 = vmul.f32 0.5, %v1664_v15 }
 0x47f   : > { %v1772_v42 = vpack.c.bf16 %v1762_v22, %v1761_v11  ;;  %v1715_v43 = vadd.f32 1.0, %v2343_v8 }
 0x480   : > { %2344 = vtanh.f32 %v1684_v27 }
 0x481   : > { %2166 = vmatmul.msk.bf16.gmra.mxu3 %vm747_vm1, %v1772_v42  ;;  %v1731_v14 = vmul.f32 0.5, %v1715_v43 }
 0x483   : > { %v1666_v28 = vpop.f32.mrf.mxu2  ;;  %v1747_v62 = vmul.f32 %v1731_v14, %v1662_v1 }
 0x484   : > { %v1667_v30 = vadd.f32 %v2914_v12, %v1666_v28 }
 0x485   : > { %v1763_v25 = vadd.f32 %v1747_v62, %v2894_v23 }
 0x486   : > { %v2345_v59 = vpop.eup %2344  ;;  %v1685_v10 = vmul.f32 0.5, %v1667_v30 }
 0x487   : > { %v1716_v19 = vadd.f32 1.0, %v2345_v59 }
 0x488   : > { %2346 = vtanh.f32 %v1685_v10 }
 0x489   : > { %v1732_v20 = vmul.f32 0.5, %v1716_v19 }
 0x48b   : > { %v1748_v36 = vmul.f32 %v1732_v20, %v1664_v15  ;;  %v1668_v0 = vpop.f32.mrf.mxu2 }
 0x48c   : > { %v1669_v54 = vadd.f32 %v2914_v12, %v1668_v0 }
 0x48d   : > { %v1764_v26 = vadd.f32 %v1748_v36, %v2897_v58  ;;  %v2221_v58 = vld [vmem:[%s3016_s16] ss:$0 sm:$0xff] }
 0x48e   : > { %v2347_v47 = vpop.eup %2346  ;;  %v1686_v29 = vmul.f32 0.5, %v1669_v54 }
 0x48f   : > { %v1773_v48 = vpack.c.bf16 %v1764_v26, %v1763_v25  ;;  %v1717_v53 = vadd.f32 1.0, %v2347_v47 }
 0x490   : > { %2348 = vtanh.f32 %v1686_v29 }
 0x491   : > { %2167 = vmatmul.msk.bf16.gmra.mxu3 %vm747_vm1, %v1773_v48  ;;  %v1733_v31 = vmul.f32 0.5, %v1717_v53 }
 0x493   : > { %v1749_v33 = vmul.f32 %v1733_v31, %v1667_v30 }
 0x495   : > { %v1765_v12 = vadd.f32 %v1749_v33, %v2903_v21 }
 0x496   : > { %v2349_v39 = vpop.eup %2348 }
 0x497   : > { %v1718_v17 = vadd.f32 1.0, %v2349_v39 }
 0x499   : > { %v1734_v18 = vmul.f32 0.5, %v1718_v17 }
 0x49b   : > { %v1750_v35 = vmul.f32 %v1734_v18, %v1669_v54 }
 0x49d   : > { %v1766_v23 = vadd.f32 %v1750_v35, %v2906_v24 }
 0x49f   : > { %v1774_v40 = vpack.c.bf16 %v1766_v23, %v1765_v12 }
 0x4a1   : > { %2168 = vmatmul.msk.bf16.gmra.mxu3 %vm747_vm1, %v1774_v40 }
 0x4b4   : > { %v1844_v21 = vpop.f32.mrf.mxu3 }
 0x4b5   : > { %v1845_v24 = vadd.f32 %v2221_v58, %v1844_v21 }
 0x4b7   : > { %1884 = vst.msk [vmem:[%s2963_s1] sm:$0xff] %vm629_vm0, %v1845_v24 }
 0x4bc   : > { %v1846_v44 = vpop.f32.mrf.mxu3 }
 0x4bd   : > { %v1847_v41 = vadd.f32 %v2221_v58, %v1846_v44 }
 0x4bf   : > { %1885 = vst.msk [vmem:[%s2963_s1 + $0x8] sm:$0xff] %vm629_vm0, %v1847_v41 }
 0x4c4   : > { %v1849_v13 = vpop.f32.mrf.mxu3 }
 0x4c5   : > { %v1850_v16 = vadd.f32 %v2221_v58, %v1849_v13 }
 0x4c7   : > { %1886 = vst.msk [vmem:[%s2963_s1 + $0x10] sm:$0xff] %vm629_vm0, %v1850_v16 }
 0x4cc   : > { %v1851_v45 = vpop.f32.mrf.mxu3 }
 0x4cd   : > { %v1852_v46 = vadd.f32 %v2221_v58, %v1851_v45 }
 0x4cf   : > { %1887 = vst.msk [vmem:[%s2963_s1 + $0x18] sm:$0xff] %vm629_vm0, %v1852_v46 }
 0x4d4   : > { %v1854_v49 = vpop.f32.mrf.mxu3 }
 0x4d5   : > { %v1855_v3 = vadd.f32 %v2221_v58, %v1854_v49 }
 0x4d7   : > { %1888 = vst.msk [vmem:[%s2963_s1 + $0x20] sm:$0xff] %vm629_vm0, %v1855_v3 }
 0x4dc   : > { %v1856_v50 = vpop.f32.mrf.mxu3 }
 0x4dd   : > { %v1857_v56 = vadd.f32 %v2221_v58, %v1856_v50 }
 0x4df   : > { %1889 = vst.msk [vmem:[%s2963_s1 + $0x28] sm:$0xff] %vm629_vm0, %v1857_v56 }
 0x4e4   : > { %v1859_v4 = vpop.f32.mrf.mxu3 }
 0x4e5   : > { %v1860_v38 = vadd.f32 %v2221_v58, %v1859_v4 }
 0x4e7   : > { %1890 = vst.msk [vmem:[%s2963_s1 + $0x30] sm:$0xff] %vm629_vm0, %v1860_v38 }
 0x4ec   : > { %v1861_v51 = vpop.f32.mrf.mxu3 }
 0x4ed   : > { %v1862_v60 = vadd.f32 %v2221_v58, %v1861_v51 }
 0x4ef   : > { %1891 = vst.msk [vmem:[%s2963_s1 + $0x38] sm:$0xff] %vm629_vm0, %v1862_v60 }
 0x4f4   : > { %v1864_v52 = vpop.f32.mrf.mxu3 }
 0x4f5   : > { %v1865_v37 = vadd.f32 %v2221_v58, %v1864_v52 }
 0x4f7   : > { %1892 = vst.msk [vmem:[%s2963_s1 + $0x40] sm:$0xff] %vm629_vm0, %v1865_v37 }
 0x4fc   : > { %v1866_v55 = vpop.f32.mrf.mxu3 }
 0x4fd   : > { %v1867_v57 = vadd.f32 %v2221_v58, %v1866_v55 }
 0x4ff   : > { %1893 = vst.msk [vmem:[%s2963_s1 + $0x48] sm:$0xff] %vm629_vm0, %v1867_v57 }
 0x504   : > { %v1869_v63 = vpop.f32.mrf.mxu3 }
 0x505   : > { %v1870_v1 = vadd.f32 %v2221_v58, %v1869_v63 }
 0x507   : > { %1894 = vst.msk [vmem:[%s2963_s1 + $0x50] sm:$0xff] %vm629_vm0, %v1870_v1 }
 0x50c   : > { %v1871_v2 = vpop.f32.mrf.mxu3 }
 0x50d   : > { %v1872_v6 = vadd.f32 %v2221_v58, %v1871_v2 }
 0x50f   : > { %1895 = vst.msk [vmem:[%s2963_s1 + $0x58] sm:$0xff] %vm629_vm0, %v1872_v6 }
 0x514   : > { %v1874_v5 = vpop.f32.mrf.mxu3 }
 0x515   : > { %v1875_v7 = vadd.f32 %v2221_v58, %v1874_v5 }
 0x517   : > { %1896 = vst.msk [vmem:[%s2963_s1 + $0x60] sm:$0xff] %vm629_vm0, %v1875_v7 }
 0x51c   : > { %v1876_v34 = vpop.f32.mrf.mxu3 }
 0x51d   : > { %v1877_v61 = vadd.f32 %v2221_v58, %v1876_v34 }
 0x51f   : > { %1897 = vst.msk [vmem:[%s2963_s1 + $0x68] sm:$0xff] %vm629_vm0, %v1877_v61 }
 0x524   : > { %v1879_v9 = vpop.f32.mrf.mxu3 }
 0x525   : > { %v1880_v32 = vadd.f32 %v2221_v58, %v1879_v9 }
 0x527   : > { %1898 = vst.msk [vmem:[%s2963_s1 + $0x70] sm:$0xff] %vm629_vm0, %v1880_v32 }
 0x52c   : > { %v1881_v15 = vpop.f32.mrf.mxu3 }
 0x52d   : > { %v1882_v11 = vadd.f32 %v2221_v58, %v1881_v15 }
 0x52f   : > { %1899 = vst.msk [vmem:[%s2963_s1 + $0x78] sm:$0xff] %vm629_vm0, %v1882_v11 }
 0x530 PF: > { %s27_s24 = sadd.s32 1, %s2356_s24  }
 0x531   : > { %p24_p4 = scmp.ge.s32.totalorder %s27_s24, 4  }
 0x533   :  { %26 = sbr.rel (!%p24_p4) target bundleno = 3 (0x3), region = 118 }

</bundles_post_ra>
